<compile_context>
chip_gen: v6e
topology: v6e:2x2x1
jax: 0.10.0
libtpu: 0.0.40
codegen_flags: <defaults>
</compile_context>

<pallas_src>
import math
from functools import partial

import jax
import jax.numpy as jnp
from jax.experimental import pallas as pl
from jax.experimental.pallas import tpu as pltpu


def _full_spec(shape):
    nd = len(shape)
    return pl.BlockSpec(shape, lambda i, _nd=nd: (0,) * _nd)


# ----------------------------------------------------------------------------
# Kernel 1: fused encoder  (GRU -> q_mu / q_logvar -> reparameterize -> KL)
# ----------------------------------------------------------------------------
def _encoder_kernel(x_ref, eps_ref, wih_ref, whh_ref, bih_ref, bhh_ref,
                    wmu_ref, bmu_ref, wlv_ref, blv_ref,
                    z_ref, kl_ref, *, T, B):
    H = whh_ref.shape[0]

    # Input-to-hidden projection for ALL timesteps in one stacked matmul
    # ([T*B, V] @ [V, 3H]); only the recurrent gh matmul stays in the loop.
    gi_all = (jnp.dot(x_ref[...], wih_ref[...],
                      preferred_element_type=jnp.float32) + bih_ref[...])

    whh = whh_ref[...]
    bhh = bhh_ref[...]
    h = jnp.zeros((B, H), jnp.float32)
    # T is small & static -> fully unrolled straight-line recurrence.
    for t in range(T):
        gi = gi_all[t * B:(t + 1) * B, :]
        gh = jnp.dot(h, whh, preferred_element_type=jnp.float32) + bhh
        r = jax.nn.sigmoid(gi[:, :H] + gh[:, :H])
        zg = jax.nn.sigmoid(gi[:, H:2 * H] + gh[:, H:2 * H])
        n = jnp.tanh(gi[:, 2 * H:] + r * gh[:, 2 * H:])
        h = (1.0 - zg) * n + zg * h

    mu = jnp.dot(h, wmu_ref[...], preferred_element_type=jnp.float32) + bmu_ref[...]
    logvar = jnp.dot(h, wlv_ref[...], preferred_element_type=jnp.float32) + blv_ref[...]
    z_ref[...] = mu + jnp.exp(0.5 * logvar) * eps_ref[...]
    term = jnp.exp(logvar) + mu * mu - 1.0 - logvar
    kl_ref[...] = 0.5 * jnp.sum(term, keepdims=True) / float(B)


def encoder_forward(x2d, eps, p):
    TB, _ = x2d.shape
    B, Z = eps.shape
    T = TB // B
    args = (x2d, eps, p["enc_wih"], p["enc_whh"], p["enc_bih"], p["enc_bhh"],
            p["wmu"], p["bmu"], p["wlv"], p["blv"])
    return pl.pallas_call(
        partial(_encoder_kernel, T=T, B=B),
        out_shape=(jax.ShapeDtypeStruct((B, Z), jnp.float32),
                   jax.ShapeDtypeStruct((1, 1), jnp.float32)),
        grid=(1,),
        in_specs=[_full_spec(a.shape) for a in args],
        out_specs=(_full_spec((B, Z)), _full_spec((1, 1))),
        compiler_params=pltpu.CompilerParams(dimension_semantics=("arbitrary",)),
    )(*args)


# ----------------------------------------------------------------------------
# Kernel 2: fused decoder  (decoder_lat -> GRU -> decoder_fc -> cross-entropy)
# ----------------------------------------------------------------------------
def _decoder_kernel(x_ref, z_ref, tgt_ref, wlat_ref, blat_ref,
                    wihx_ref, wihz_ref, whh_ref, bih_ref, bhh_ref,
                    wfc_ref, bfc_ref, loss_ref, *, T, B):
    H = whh_ref.shape[0]

    zv = z_ref[...]
    # x-part of the input projection for all T steps in one matmul, plus a
    # single z-part matmul reused every step (dec_in concat never built).
    gi_all = (jnp.dot(x_ref[...], wihx_ref[...],
                      preferred_element_type=jnp.float32) + bih_ref[...])
    gi_z = jnp.dot(zv, wihz_ref[...], preferred_element_type=jnp.float32)

    # h_0 = decoder_lat(z)
    h = jnp.dot(zv, wlat_ref[...], preferred_element_type=jnp.float32) + blat_ref[...]
    whh = whh_ref[...]
    bhh = bhh_ref[...]
    hs = []
    for t in range(T):
        gi = gi_all[t * B:(t + 1) * B, :] + gi_z
        gh = jnp.dot(h, whh, preferred_element_type=jnp.float32) + bhh
        r = jax.nn.sigmoid(gi[:, :H] + gh[:, :H])
        zg = jax.nn.sigmoid(gi[:, H:2 * H] + gh[:, H:2 * H])
        n = jnp.tanh(gi[:, 2 * H:] + r * gh[:, 2 * H:])
        h = (1.0 - zg) * n + zg * h
        hs.append(h)

    # Batched decoder_fc + cross-entropy over all (t, b) rows at once.
    hs_all = jnp.concatenate(hs, axis=0)                         # (T*B, H)
    logits = (jnp.dot(hs_all, wfc_ref[...],
                      preferred_element_type=jnp.float32) + bfc_ref[...])  # (T*B, V)

    tgt = tgt_ref[...]                       # masked one-hot: zero row == ignored
    m = jnp.max(logits, axis=1, keepdims=True)
    lse = m + jnp.log(jnp.sum(jnp.exp(logits - m), axis=1, keepdims=True))
    valid = jnp.sum(tgt, axis=1, keepdims=True)                  # (T*B, 1) in {0,1}
    tgt_logit = jnp.sum(tgt * logits, axis=1, keepdims=True)     # 0 for ignored rows
    total = jnp.sum(valid * lse - tgt_logit, keepdims=True)      # (1, 1)
    cnt = jnp.sum(valid, keepdims=True)                          # (1, 1)
    loss_ref[...] = total / jnp.maximum(cnt, 1.0)                # guard 0/0


def decoder_forward(x2d, z, tgt2d, p):
    TB = x2d.shape[0]
    B = z.shape[0]
    T = TB // B
    args = (x2d, z, tgt2d, p["wlat"], p["blat"],
            p["dec_wih_x"], p["dec_wih_z"], p["dec_whh"],
            p["dec_bih"], p["dec_bhh"], p["wfc"], p["bfc"])
    return pl.pallas_call(
        partial(_decoder_kernel, T=T, B=B),
        out_shape=jax.ShapeDtypeStruct((1, 1), jnp.float32),
        grid=(1,),
        in_specs=[_full_spec(a.shape) for a in args],
        out_specs=_full_spec((1, 1)),
        compiler_params=pltpu.CompilerParams(dimension_semantics=("arbitrary",)),
    )(*args)


# ----------------------------------------------------------------------------
# Parameter init (deterministic, PyTorch-like uniform ranges)
# Weights stored [in, out]; GRU gates stacked along the last axis as [r|z|n].
# ----------------------------------------------------------------------------
def init_params(key, V, He, Z, Hd):
    ks = jax.random.split(key, 17)

    def unif(k, shape, bound):
        return jax.random.uniform(k, shape, jnp.float32, -bound, bound)

    be, bd = 1.0 / math.sqrt(He), 1.0 / math.sqrt(Hd)
    bq, bl = 1.0 / math.sqrt(He), 1.0 / math.sqrt(Z)
    return dict(
        enc_wih=unif(ks[0], (V, 3 * He), be),
        enc_whh=unif(ks[1], (He, 3 * He), be),
        enc_bih=unif(ks[2], (1, 3 * He), be),
        enc_bhh=unif(ks[3], (1, 3 * He), be),
        wmu=unif(ks[4], (He, Z), bq), bmu=unif(ks[5], (1, Z), bq),
        wlv=unif(ks[6], (He, Z), bq), blv=unif(ks[7], (1, Z), bq),
        wlat=unif(ks[8], (Z, Hd), bl), blat=unif(ks[9], (1, Hd), bl),
        dec_wih_x=unif(ks[10], (V, 3 * Hd), bd),
        dec_wih_z=unif(ks[11], (Z, 3 * Hd), bd),
        dec_whh=unif(ks[12], (Hd, 3 * Hd), bd),
        dec_bih=unif(ks[13], (1, 3 * Hd), bd),
        dec_bhh=unif(ks[14], (1, 3 * Hd), bd),
        wfc=unif(ks[15], (Hd, V), bd), bfc=unif(ks[16], (1, V), bd),
    )


# ----------------------------------------------------------------------------
# Full VAE forward (tiny glue in XLA, all hot math in the two fused kernels)
# ----------------------------------------------------------------------------
# TODO(synk): variable-length pack_sequence/pack_padded_sequence are not
# modeled; all sequences are assumed equal length (pack/pad become identity).
@partial(jax.jit, static_argnames=("pad_id", "vocab_size"))
def vae_forward(params, input_ids, eps, *, pad_id, vocab_size):
    B, T = input_ids.shape
    V = vocab_size

    # Embedding weight was copied from torch.eye(V) -> one-hot lookup (glue).
    # Time-major, flattened so row index = t*B + b.
    x_tm = jnp.transpose(jax.nn.one_hot(input_ids, V, dtype=jnp.float32),
                         (1, 0, 2))                               # (T, B, V)
    x2d = x_tm.reshape(T * B, V)

    # ---- encoder (GRU + head fused) ----
    z, kl = encoder_forward(x2d, eps, params)                     # (B,Z), (1,1)

    # CE targets: token t+1 predicted from step t; last step and pad targets
    # are ignored by zeroing their one-hot row (ignore_index semantics).
    shifted = jnp.concatenate(
        [input_ids[:, 1:], jnp.full((B, 1), pad_id, input_ids.dtype)], axis=1)
    valid = (shifted != pad_id).astype(jnp.float32)               # (B, T)
    tgt_tm = jnp.transpose(
        jax.nn.one_hot(shifted, V, dtype=jnp.float32) * valid[:, :, None],
        (1, 0, 2))                                                # (T, B, V)
    tgt2d = tgt_tm.reshape(T * B, V)

    # ---- decoder (lat + GRU + fc + CE fused) ----
    recon = decoder_forward(x2d, z, tgt2d, params)                # (1, 1)
    return kl[0, 0], recon[0, 0]


if __name__ == "__main__":
    VOCAB, ENC_H, Z_DIM, DEC_H = 16, 32, 16, 32
    BATCH, SEQ = 2, 8
    PAD_ID = 0

    key = jax.random.PRNGKey(0)
    k_param, k_ids, k_eps = jax.random.split(key, 3)

    params = init_params(k_param, VOCAB, ENC_H, Z_DIM, DEC_H)
    # tokens in [1, VOCAB) so no pad tokens inside the (equal-length) sequences
    input_ids = jax.random.randint(k_ids, (BATCH, SEQ), 1, VOCAB, dtype=jnp.int32)
    eps = jax.random.normal(k_eps, (BATCH, Z_DIM), jnp.float32)

    kl_loss, recon_loss = vae_forward(params, input_ids, eps,
                                      pad_id=PAD_ID, vocab_size=VOCAB)
    jax.block_until_ready((kl_loss, recon_loss))
    assert jnp.isfinite(kl_loss) and jnp.isfinite(recon_loss)
    print("KERNEL_OK")
</pallas_src>

<mosaic_0001>
module attributes {stable_mosaic.version = 11 : i64} {
  func.func @_encoder_kernel(%arg0: i32, %arg1: memref<16x16xf32, #tpu.memory_space<vmem>>, %arg2: memref<2x16xf32, #tpu.memory_space<vmem>>, %arg3: memref<16x96xf32, #tpu.memory_space<vmem>>, %arg4: memref<32x96xf32, #tpu.memory_space<vmem>>, %arg5: memref<1x96xf32, #tpu.memory_space<vmem>>, %arg6: memref<1x96xf32, #tpu.memory_space<vmem>>, %arg7: memref<32x16xf32, #tpu.memory_space<vmem>>, %arg8: memref<1x16xf32, #tpu.memory_space<vmem>>, %arg9: memref<32x16xf32, #tpu.memory_space<vmem>>, %arg10: memref<1x16xf32, #tpu.memory_space<vmem>>, %arg11: memref<2x16xf32, #tpu.memory_space<vmem>>, %arg12: memref<1x1xf32, #tpu.memory_space<vmem>>) attributes {dimension_semantics = [#tpu.dimension_semantics<arbitrary>], iteration_bounds = array<i64: 1>, scalar_prefetch = 0 : i64, scratch_operands = 0 : i64, tpu.core_type = #tpu.core_type<tc>, window_params = [{pipeline_mode = #tpu.pipeline_mode<synchronous>, transform_indices = @transform_0, window_bounds = array<i64: 16, 16>}, {pipeline_mode = #tpu.pipeline_mode<synchronous>, transform_indices = @transform_1, window_bounds = array<i64: 2, 16>}, {pipeline_mode = #tpu.pipeline_mode<synchronous>, transform_indices = @transform_2, window_bounds = array<i64: 16, 96>}, {pipeline_mode = #tpu.pipeline_mode<synchronous>, transform_indices = @transform_3, window_bounds = array<i64: 32, 96>}, {pipeline_mode = #tpu.pipeline_mode<synchronous>, transform_indices = @transform_4, window_bounds = array<i64: 1, 96>}, {pipeline_mode = #tpu.pipeline_mode<synchronous>, transform_indices = @transform_5, window_bounds = array<i64: 1, 96>}, {pipeline_mode = #tpu.pipeline_mode<synchronous>, transform_indices = @transform_6, window_bounds = array<i64: 32, 16>}, {pipeline_mode = #tpu.pipeline_mode<synchronous>, transform_indices = @transform_7, window_bounds = array<i64: 1, 16>}, {pipeline_mode = #tpu.pipeline_mode<synchronous>, transform_indices = @transform_8, window_bounds = array<i64: 32, 16>}, {pipeline_mode = #tpu.pipeline_mode<synchronous>, transform_indices = @transform_9, window_bounds = array<i64: 1, 16>}, {pipeline_mode = #tpu.pipeline_mode<synchronous>, transform_indices = @transform_10, window_bounds = array<i64: 2, 16>}, {pipeline_mode = #tpu.pipeline_mode<synchronous>, transform_indices = @transform_11, window_bounds = array<i64: 1, 1>}]} {
    %c0 = arith.constant 0 : index
    %c0_0 = arith.constant 0 : index
    %0 = vector.load %arg1[%c0, %c0_0] : memref<16x16xf32, #tpu.memory_space<vmem>>, vector<16x16xf32>
    %c0_1 = arith.constant 0 : index
    %c0_2 = arith.constant 0 : index
    %1 = vector.load %arg3[%c0_1, %c0_2] : memref<16x96xf32, #tpu.memory_space<vmem>>, vector<16x96xf32>
    %cst = arith.constant dense<0.000000e+00> : vector<16x96xf32>
    %2 = tpu.matmul %0, %1, %cst {dimension_numbers = #tpu.dot_dimension_numbers<[1], [0], [0], [1], [0, 0, 1, 1], [], []>} : vector<16x16xf32>, vector<16x96xf32>, vector<16x96xf32> -> vector<16x96xf32>
    %c0_3 = arith.constant 0 : index
    %c0_4 = arith.constant 0 : index
    %3 = vector.load %arg5[%c0_3, %c0_4] : memref<1x96xf32, #tpu.memory_space<vmem>>, vector<1x96xf32>
    %4 = vector.broadcast %3 : vector<1x96xf32> to vector<16x96xf32>
    %5 = arith.addf %2, %4 : vector<16x96xf32>
    %c0_5 = arith.constant 0 : index
    %c0_6 = arith.constant 0 : index
    %6 = vector.load %arg4[%c0_5, %c0_6] : memref<32x96xf32, #tpu.memory_space<vmem>>, vector<32x96xf32>
    %c0_7 = arith.constant 0 : index
    %c0_8 = arith.constant 0 : index
    %7 = vector.load %arg6[%c0_7, %c0_8] : memref<1x96xf32, #tpu.memory_space<vmem>>, vector<1x96xf32>
    %cst_9 = arith.constant 0.000000e+00 : f32
    %8 = vector.broadcast %cst_9 : f32 to vector<2x32xf32>
    %9 = vector.extract_strided_slice %5 {offsets = [0, 0], sizes = [2, 96], strides = [1, 1]} : vector<16x96xf32> to vector<2x96xf32>
    %cst_10 = arith.constant dense<0.000000e+00> : vector<2x96xf32>
    %10 = tpu.matmul %8, %6, %cst_10 {dimension_numbers = #tpu.dot_dimension_numbers<[1], [0], [0], [1], [0, 0, 1, 1], [], []>} : vector<2x32xf32>, vector<32x96xf32>, vector<2x96xf32> -> vector<2x96xf32>
    %11 = vector.broadcast %7 : vector<1x96xf32> to vector<2x96xf32>
    %12 = arith.addf %10, %11 : vector<2x96xf32>
    %13 = vector.extract_strided_slice %9 {offsets = [0, 0], sizes = [2, 32], strides = [1, 1]} : vector<2x96xf32> to vector<2x32xf32>
    %14 = vector.extract_strided_slice %12 {offsets = [0, 0], sizes = [2, 32], strides = [1, 1]} : vector<2x96xf32> to vector<2x32xf32>
    %15 = arith.addf %13, %14 : vector<2x32xf32>
    %16 = arith.negf %15 : vector<2x32xf32>
    %17 = math.exp %16 : vector<2x32xf32>
    %cst_11 = arith.constant 1.000000e+00 : f32
    %18 = vector.broadcast %cst_11 : f32 to vector<2x32xf32>
    %19 = arith.addf %18, %17 : vector<2x32xf32>
    %20 = arith.divf %18, %19 : vector<2x32xf32>
    %21 = vector.extract_strided_slice %9 {offsets = [0, 32], sizes = [2, 32], strides = [1, 1]} : vector<2x96xf32> to vector<2x32xf32>
    %22 = vector.extract_strided_slice %12 {offsets = [0, 32], sizes = [2, 32], strides = [1, 1]} : vector<2x96xf32> to vector<2x32xf32>
    %23 = arith.addf %21, %22 : vector<2x32xf32>
    %24 = arith.negf %23 : vector<2x32xf32>
    %25 = math.exp %24 : vector<2x32xf32>
    %cst_12 = arith.constant 1.000000e+00 : f32
    %26 = vector.broadcast %cst_12 : f32 to vector<2x32xf32>
    %27 = arith.addf %26, %25 : vector<2x32xf32>
    %28 = arith.divf %26, %27 : vector<2x32xf32>
    %29 = vector.extract_strided_slice %9 {offsets = [0, 64], sizes = [2, 32], strides = [1, 1]} : vector<2x96xf32> to vector<2x32xf32>
    %30 = vector.extract_strided_slice %12 {offsets = [0, 64], sizes = [2, 32], strides = [1, 1]} : vector<2x96xf32> to vector<2x32xf32>
    %31 = arith.mulf %20, %30 : vector<2x32xf32>
    %32 = arith.addf %29, %31 : vector<2x32xf32>
    %33 = math.tanh %32 : vector<2x32xf32>
    %cst_13 = arith.constant 1.000000e+00 : f32
    %34 = vector.broadcast %cst_13 : f32 to vector<2x32xf32>
    %35 = arith.subf %34, %28 : vector<2x32xf32>
    %36 = arith.mulf %35, %33 : vector<2x32xf32>
    %37 = arith.mulf %28, %8 : vector<2x32xf32>
    %38 = arith.addf %36, %37 : vector<2x32xf32>
    %39 = vector.extract_strided_slice %5 {offsets = [2, 0], sizes = [2, 96], strides = [1, 1]} : vector<16x96xf32> to vector<2x96xf32>
    %cst_14 = arith.constant dense<0.000000e+00> : vector<2x96xf32>
    %40 = tpu.matmul %38, %6, %cst_14 {dimension_numbers = #tpu.dot_dimension_numbers<[1], [0], [0], [1], [0, 0, 1, 1], [], []>} : vector<2x32xf32>, vector<32x96xf32>, vector<2x96xf32> -> vector<2x96xf32>
    %41 = vector.broadcast %7 : vector<1x96xf32> to vector<2x96xf32>
    %42 = arith.addf %40, %41 : vector<2x96xf32>
    %43 = vector.extract_strided_slice %39 {offsets = [0, 0], sizes = [2, 32], strides = [1, 1]} : vector<2x96xf32> to vector<2x32xf32>
    %44 = vector.extract_strided_slice %42 {offsets = [0, 0], sizes = [2, 32], strides = [1, 1]} : vector<2x96xf32> to vector<2x32xf32>
    %45 = arith.addf %43, %44 : vector<2x32xf32>
    %46 = arith.negf %45 : vector<2x32xf32>
    %47 = math.exp %46 : vector<2x32xf32>
    %cst_15 = arith.constant 1.000000e+00 : f32
    %48 = vector.broadcast %cst_15 : f32 to vector<2x32xf32>
    %49 = arith.addf %48, %47 : vector<2x32xf32>
    %50 = arith.divf %48, %49 : vector<2x32xf32>
    %51 = vector.extract_strided_slice %39 {offsets = [0, 32], sizes = [2, 32], strides = [1, 1]} : vector<2x96xf32> to vector<2x32xf32>
    %52 = vector.extract_strided_slice %42 {offsets = [0, 32], sizes = [2, 32], strides = [1, 1]} : vector<2x96xf32> to vector<2x32xf32>
    %53 = arith.addf %51, %52 : vector<2x32xf32>
    %54 = arith.negf %53 : vector<2x32xf32>
    %55 = math.exp %54 : vector<2x32xf32>
    %cst_16 = arith.constant 1.000000e+00 : f32
    %56 = vector.broadcast %cst_16 : f32 to vector<2x32xf32>
    %57 = arith.addf %56, %55 : vector<2x32xf32>
    %58 = arith.divf %56, %57 : vector<2x32xf32>
    %59 = vector.extract_strided_slice %39 {offsets = [0, 64], sizes = [2, 32], strides = [1, 1]} : vector<2x96xf32> to vector<2x32xf32>
    %60 = vector.extract_strided_slice %42 {offsets = [0, 64], sizes = [2, 32], strides = [1, 1]} : vector<2x96xf32> to vector<2x32xf32>
    %61 = arith.mulf %50, %60 : vector<2x32xf32>
    %62 = arith.addf %59, %61 : vector<2x32xf32>
    %63 = math.tanh %62 : vector<2x32xf32>
    %cst_17 = arith.constant 1.000000e+00 : f32
    %64 = vector.broadcast %cst_17 : f32 to vector<2x32xf32>
    %65 = arith.subf %64, %58 : vector<2x32xf32>
    %66 = arith.mulf %65, %63 : vector<2x32xf32>
    %67 = arith.mulf %58, %38 : vector<2x32xf32>
    %68 = arith.addf %66, %67 : vector<2x32xf32>
    %69 = vector.extract_strided_slice %5 {offsets = [4, 0], sizes = [2, 96], strides = [1, 1]} : vector<16x96xf32> to vector<2x96xf32>
    %cst_18 = arith.constant dense<0.000000e+00> : vector<2x96xf32>
    %70 = tpu.matmul %68, %6, %cst_18 {dimension_numbers = #tpu.dot_dimension_numbers<[1], [0], [0], [1], [0, 0, 1, 1], [], []>} : vector<2x32xf32>, vector<32x96xf32>, vector<2x96xf32> -> vector<2x96xf32>
    %71 = vector.broadcast %7 : vector<1x96xf32> to vector<2x96xf32>
    %72 = arith.addf %70, %71 : vector<2x96xf32>
    %73 = vector.extract_strided_slice %69 {offsets = [0, 0], sizes = [2, 32], strides = [1, 1]} : vector<2x96xf32> to vector<2x32xf32>
    %74 = vector.extract_strided_slice %72 {offsets = [0, 0], sizes = [2, 32], strides = [1, 1]} : vector<2x96xf32> to vector<2x32xf32>
    %75 = arith.addf %73, %74 : vector<2x32xf32>
    %76 = arith.negf %75 : vector<2x32xf32>
    %77 = math.exp %76 : vector<2x32xf32>
    %cst_19 = arith.constant 1.000000e+00 : f32
    %78 = vector.broadcast %cst_19 : f32 to vector<2x32xf32>
    %79 = arith.addf %78, %77 : vector<2x32xf32>
    %80 = arith.divf %78, %79 : vector<2x32xf32>
    %81 = vector.extract_strided_slice %69 {offsets = [0, 32], sizes = [2, 32], strides = [1, 1]} : vector<2x96xf32> to vector<2x32xf32>
    %82 = vector.extract_strided_slice %72 {offsets = [0, 32], sizes = [2, 32], strides = [1, 1]} : vector<2x96xf32> to vector<2x32xf32>
    %83 = arith.addf %81, %82 : vector<2x32xf32>
    %84 = arith.negf %83 : vector<2x32xf32>
    %85 = math.exp %84 : vector<2x32xf32>
    %cst_20 = arith.constant 1.000000e+00 : f32
    %86 = vector.broadcast %cst_20 : f32 to vector<2x32xf32>
    %87 = arith.addf %86, %85 : vector<2x32xf32>
    %88 = arith.divf %86, %87 : vector<2x32xf32>
    %89 = vector.extract_strided_slice %69 {offsets = [0, 64], sizes = [2, 32], strides = [1, 1]} : vector<2x96xf32> to vector<2x32xf32>
    %90 = vector.extract_strided_slice %72 {offsets = [0, 64], sizes = [2, 32], strides = [1, 1]} : vector<2x96xf32> to vector<2x32xf32>
    %91 = arith.mulf %80, %90 : vector<2x32xf32>
    %92 = arith.addf %89, %91 : vector<2x32xf32>
    %93 = math.tanh %92 : vector<2x32xf32>
    %cst_21 = arith.constant 1.000000e+00 : f32
    %94 = vector.broadcast %cst_21 : f32 to vector<2x32xf32>
    %95 = arith.subf %94, %88 : vector<2x32xf32>
    %96 = arith.mulf %95, %93 : vector<2x32xf32>
    %97 = arith.mulf %88, %68 : vector<2x32xf32>
    %98 = arith.addf %96, %97 : vector<2x32xf32>
    %99 = vector.extract_strided_slice %5 {offsets = [6, 0], sizes = [2, 96], strides = [1, 1]} : vector<16x96xf32> to vector<2x96xf32>
    %cst_22 = arith.constant dense<0.000000e+00> : vector<2x96xf32>
    %100 = tpu.matmul %98, %6, %cst_22 {dimension_numbers = #tpu.dot_dimension_numbers<[1], [0], [0], [1], [0, 0, 1, 1], [], []>} : vector<2x32xf32>, vector<32x96xf32>, vector<2x96xf32> -> vector<2x96xf32>
    %101 = vector.broadcast %7 : vector<1x96xf32> to vector<2x96xf32>
    %102 = arith.addf %100, %101 : vector<2x96xf32>
    %103 = vector.extract_strided_slice %99 {offsets = [0, 0], sizes = [2, 32], strides = [1, 1]} : vector<2x96xf32> to vector<2x32xf32>
    %104 = vector.extract_strided_slice %102 {offsets = [0, 0], sizes = [2, 32], strides = [1, 1]} : vector<2x96xf32> to vector<2x32xf32>
    %105 = arith.addf %103, %104 : vector<2x32xf32>
    %106 = arith.negf %105 : vector<2x32xf32>
    %107 = math.exp %106 : vector<2x32xf32>
    %cst_23 = arith.constant 1.000000e+00 : f32
    %108 = vector.broadcast %cst_23 : f32 to vector<2x32xf32>
    %109 = arith.addf %108, %107 : vector<2x32xf32>
    %110 = arith.divf %108, %109 : vector<2x32xf32>
    %111 = vector.extract_strided_slice %99 {offsets = [0, 32], sizes = [2, 32], strides = [1, 1]} : vector<2x96xf32> to vector<2x32xf32>
    %112 = vector.extract_strided_slice %102 {offsets = [0, 32], sizes = [2, 32], strides = [1, 1]} : vector<2x96xf32> to vector<2x32xf32>
    %113 = arith.addf %111, %112 : vector<2x32xf32>
    %114 = arith.negf %113 : vector<2x32xf32>
    %115 = math.exp %114 : vector<2x32xf32>
    %cst_24 = arith.constant 1.000000e+00 : f32
    %116 = vector.broadcast %cst_24 : f32 to vector<2x32xf32>
    %117 = arith.addf %116, %115 : vector<2x32xf32>
    %118 = arith.divf %116, %117 : vector<2x32xf32>
    %119 = vector.extract_strided_slice %99 {offsets = [0, 64], sizes = [2, 32], strides = [1, 1]} : vector<2x96xf32> to vector<2x32xf32>
    %120 = vector.extract_strided_slice %102 {offsets = [0, 64], sizes = [2, 32], strides = [1, 1]} : vector<2x96xf32> to vector<2x32xf32>
    %121 = arith.mulf %110, %120 : vector<2x32xf32>
    %122 = arith.addf %119, %121 : vector<2x32xf32>
    %123 = math.tanh %122 : vector<2x32xf32>
    %cst_25 = arith.constant 1.000000e+00 : f32
    %124 = vector.broadcast %cst_25 : f32 to vector<2x32xf32>
    %125 = arith.subf %124, %118 : vector<2x32xf32>
    %126 = arith.mulf %125, %123 : vector<2x32xf32>
    %127 = arith.mulf %118, %98 : vector<2x32xf32>
    %128 = arith.addf %126, %127 : vector<2x32xf32>
    %129 = vector.extract_strided_slice %5 {offsets = [8, 0], sizes = [2, 96], strides = [1, 1]} : vector<16x96xf32> to vector<2x96xf32>
    %cst_26 = arith.constant dense<0.000000e+00> : vector<2x96xf32>
    %130 = tpu.matmul %128, %6, %cst_26 {dimension_numbers = #tpu.dot_dimension_numbers<[1], [0], [0], [1], [0, 0, 1, 1], [], []>} : vector<2x32xf32>, vector<32x96xf32>, vector<2x96xf32> -> vector<2x96xf32>
    %131 = vector.broadcast %7 : vector<1x96xf32> to vector<2x96xf32>
    %132 = arith.addf %130, %131 : vector<2x96xf32>
    %133 = vector.extract_strided_slice %129 {offsets = [0, 0], sizes = [2, 32], strides = [1, 1]} : vector<2x96xf32> to vector<2x32xf32>
    %134 = vector.extract_strided_slice %132 {offsets = [0, 0], sizes = [2, 32], strides = [1, 1]} : vector<2x96xf32> to vector<2x32xf32>
    %135 = arith.addf %133, %134 : vector<2x32xf32>
    %136 = arith.negf %135 : vector<2x32xf32>
    %137 = math.exp %136 : vector<2x32xf32>
    %cst_27 = arith.constant 1.000000e+00 : f32
    %138 = vector.broadcast %cst_27 : f32 to vector<2x32xf32>
    %139 = arith.addf %138, %137 : vector<2x32xf32>
    %140 = arith.divf %138, %139 : vector<2x32xf32>
    %141 = vector.extract_strided_slice %129 {offsets = [0, 32], sizes = [2, 32], strides = [1, 1]} : vector<2x96xf32> to vector<2x32xf32>
    %142 = vector.extract_strided_slice %132 {offsets = [0, 32], sizes = [2, 32], strides = [1, 1]} : vector<2x96xf32> to vector<2x32xf32>
    %143 = arith.addf %141, %142 : vector<2x32xf32>
    %144 = arith.negf %143 : vector<2x32xf32>
    %145 = math.exp %144 : vector<2x32xf32>
    %cst_28 = arith.constant 1.000000e+00 : f32
    %146 = vector.broadcast %cst_28 : f32 to vector<2x32xf32>
    %147 = arith.addf %146, %145 : vector<2x32xf32>
    %148 = arith.divf %146, %147 : vector<2x32xf32>
    %149 = vector.extract_strided_slice %129 {offsets = [0, 64], sizes = [2, 32], strides = [1, 1]} : vector<2x96xf32> to vector<2x32xf32>
    %150 = vector.extract_strided_slice %132 {offsets = [0, 64], sizes = [2, 32], strides = [1, 1]} : vector<2x96xf32> to vector<2x32xf32>
    %151 = arith.mulf %140, %150 : vector<2x32xf32>
    %152 = arith.addf %149, %151 : vector<2x32xf32>
    %153 = math.tanh %152 : vector<2x32xf32>
    %cst_29 = arith.constant 1.000000e+00 : f32
    %154 = vector.broadcast %cst_29 : f32 to vector<2x32xf32>
    %155 = arith.subf %154, %148 : vector<2x32xf32>
    %156 = arith.mulf %155, %153 : vector<2x32xf32>
    %157 = arith.mulf %148, %128 : vector<2x32xf32>
    %158 = arith.addf %156, %157 : vector<2x32xf32>
    %159 = vector.extract_strided_slice %5 {offsets = [10, 0], sizes = [2, 96], strides = [1, 1]} : vector<16x96xf32> to vector<2x96xf32>
    %cst_30 = arith.constant dense<0.000000e+00> : vector<2x96xf32>
    %160 = tpu.matmul %158, %6, %cst_30 {dimension_numbers = #tpu.dot_dimension_numbers<[1], [0], [0], [1], [0, 0, 1, 1], [], []>} : vector<2x32xf32>, vector<32x96xf32>, vector<2x96xf32> -> vector<2x96xf32>
    %161 = vector.broadcast %7 : vector<1x96xf32> to vector<2x96xf32>
    %162 = arith.addf %160, %161 : vector<2x96xf32>
    %163 = vector.extract_strided_slice %159 {offsets = [0, 0], sizes = [2, 32], strides = [1, 1]} : vector<2x96xf32> to vector<2x32xf32>
    %164 = vector.extract_strided_slice %162 {offsets = [0, 0], sizes = [2, 32], strides = [1, 1]} : vector<2x96xf32> to vector<2x32xf32>
    %165 = arith.addf %163, %164 : vector<2x32xf32>
    %166 = arith.negf %165 : vector<2x32xf32>
    %167 = math.exp %166 : vector<2x32xf32>
    %cst_31 = arith.constant 1.000000e+00 : f32
    %168 = vector.broadcast %cst_31 : f32 to vector<2x32xf32>
    %169 = arith.addf %168, %167 : vector<2x32xf32>
    %170 = arith.divf %168, %169 : vector<2x32xf32>
    %171 = vector.extract_strided_slice %159 {offsets = [0, 32], sizes = [2, 32], strides = [1, 1]} : vector<2x96xf32> to vector<2x32xf32>
    %172 = vector.extract_strided_slice %162 {offsets = [0, 32], sizes = [2, 32], strides = [1, 1]} : vector<2x96xf32> to vector<2x32xf32>
    %173 = arith.addf %171, %172 : vector<2x32xf32>
    %174 = arith.negf %173 : vector<2x32xf32>
    %175 = math.exp %174 : vector<2x32xf32>
    %cst_32 = arith.constant 1.000000e+00 : f32
    %176 = vector.broadcast %cst_32 : f32 to vector<2x32xf32>
    %177 = arith.addf %176, %175 : vector<2x32xf32>
    %178 = arith.divf %176, %177 : vector<2x32xf32>
    %179 = vector.extract_strided_slice %159 {offsets = [0, 64], sizes = [2, 32], strides = [1, 1]} : vector<2x96xf32> to vector<2x32xf32>
    %180 = vector.extract_strided_slice %162 {offsets = [0, 64], sizes = [2, 32], strides = [1, 1]} : vector<2x96xf32> to vector<2x32xf32>
    %181 = arith.mulf %170, %180 : vector<2x32xf32>
    %182 = arith.addf %179, %181 : vector<2x32xf32>
    %183 = math.tanh %182 : vector<2x32xf32>
    %cst_33 = arith.constant 1.000000e+00 : f32
    %184 = vector.broadcast %cst_33 : f32 to vector<2x32xf32>
    %185 = arith.subf %184, %178 : vector<2x32xf32>
    %186 = arith.mulf %185, %183 : vector<2x32xf32>
    %187 = arith.mulf %178, %158 : vector<2x32xf32>
    %188 = arith.addf %186, %187 : vector<2x32xf32>
    %189 = vector.extract_strided_slice %5 {offsets = [12, 0], sizes = [2, 96], strides = [1, 1]} : vector<16x96xf32> to vector<2x96xf32>
    %cst_34 = arith.constant dense<0.000000e+00> : vector<2x96xf32>
    %190 = tpu.matmul %188, %6, %cst_34 {dimension_numbers = #tpu.dot_dimension_numbers<[1], [0], [0], [1], [0, 0, 1, 1], [], []>} : vector<2x32xf32>, vector<32x96xf32>, vector<2x96xf32> -> vector<2x96xf32>
    %191 = vector.broadcast %7 : vector<1x96xf32> to vector<2x96xf32>
    %192 = arith.addf %190, %191 : vector<2x96xf32>
    %193 = vector.extract_strided_slice %189 {offsets = [0, 0], sizes = [2, 32], strides = [1, 1]} : vector<2x96xf32> to vector<2x32xf32>
    %194 = vector.extract_strided_slice %192 {offsets = [0, 0], sizes = [2, 32], strides = [1, 1]} : vector<2x96xf32> to vector<2x32xf32>
    %195 = arith.addf %193, %194 : vector<2x32xf32>
    %196 = arith.negf %195 : vector<2x32xf32>
    %197 = math.exp %196 : vector<2x32xf32>
    %cst_35 = arith.constant 1.000000e+00 : f32
    %198 = vector.broadcast %cst_35 : f32 to vector<2x32xf32>
    %199 = arith.addf %198, %197 : vector<2x32xf32>
    %200 = arith.divf %198, %199 : vector<2x32xf32>
    %201 = vector.extract_strided_slice %189 {offsets = [0, 32], sizes = [2, 32], strides = [1, 1]} : vector<2x96xf32> to vector<2x32xf32>
    %202 = vector.extract_strided_slice %192 {offsets = [0, 32], sizes = [2, 32], strides = [1, 1]} : vector<2x96xf32> to vector<2x32xf32>
    %203 = arith.addf %201, %202 : vector<2x32xf32>
    %204 = arith.negf %203 : vector<2x32xf32>
    %205 = math.exp %204 : vector<2x32xf32>
    %cst_36 = arith.constant 1.000000e+00 : f32
    %206 = vector.broadcast %cst_36 : f32 to vector<2x32xf32>
    %207 = arith.addf %206, %205 : vector<2x32xf32>
    %208 = arith.divf %206, %207 : vector<2x32xf32>
    %209 = vector.extract_strided_slice %189 {offsets = [0, 64], sizes = [2, 32], strides = [1, 1]} : vector<2x96xf32> to vector<2x32xf32>
    %210 = vector.extract_strided_slice %192 {offsets = [0, 64], sizes = [2, 32], strides = [1, 1]} : vector<2x96xf32> to vector<2x32xf32>
    %211 = arith.mulf %200, %210 : vector<2x32xf32>
    %212 = arith.addf %209, %211 : vector<2x32xf32>
    %213 = math.tanh %212 : vector<2x32xf32>
    %cst_37 = arith.constant 1.000000e+00 : f32
    %214 = vector.broadcast %cst_37 : f32 to vector<2x32xf32>
    %215 = arith.subf %214, %208 : vector<2x32xf32>
    %216 = arith.mulf %215, %213 : vector<2x32xf32>
    %217 = arith.mulf %208, %188 : vector<2x32xf32>
    %218 = arith.addf %216, %217 : vector<2x32xf32>
    %219 = vector.extract_strided_slice %5 {offsets = [14, 0], sizes = [2, 96], strides = [1, 1]} : vector<16x96xf32> to vector<2x96xf32>
    %cst_38 = arith.constant dense<0.000000e+00> : vector<2x96xf32>
    %220 = tpu.matmul %218, %6, %cst_38 {dimension_numbers = #tpu.dot_dimension_numbers<[1], [0], [0], [1], [0, 0, 1, 1], [], []>} : vector<2x32xf32>, vector<32x96xf32>, vector<2x96xf32> -> vector<2x96xf32>
    %221 = vector.broadcast %7 : vector<1x96xf32> to vector<2x96xf32>
    %222 = arith.addf %220, %221 : vector<2x96xf32>
    %223 = vector.extract_strided_slice %219 {offsets = [0, 0], sizes = [2, 32], strides = [1, 1]} : vector<2x96xf32> to vector<2x32xf32>
    %224 = vector.extract_strided_slice %222 {offsets = [0, 0], sizes = [2, 32], strides = [1, 1]} : vector<2x96xf32> to vector<2x32xf32>
    %225 = arith.addf %223, %224 : vector<2x32xf32>
    %226 = arith.negf %225 : vector<2x32xf32>
    %227 = math.exp %226 : vector<2x32xf32>
    %cst_39 = arith.constant 1.000000e+00 : f32
    %228 = vector.broadcast %cst_39 : f32 to vector<2x32xf32>
    %229 = arith.addf %228, %227 : vector<2x32xf32>
    %230 = arith.divf %228, %229 : vector<2x32xf32>
    %231 = vector.extract_strided_slice %219 {offsets = [0, 32], sizes = [2, 32], strides = [1, 1]} : vector<2x96xf32> to vector<2x32xf32>
    %232 = vector.extract_strided_slice %222 {offsets = [0, 32], sizes = [2, 32], strides = [1, 1]} : vector<2x96xf32> to vector<2x32xf32>
    %233 = arith.addf %231, %232 : vector<2x32xf32>
    %234 = arith.negf %233 : vector<2x32xf32>
    %235 = math.exp %234 : vector<2x32xf32>
    %cst_40 = arith.constant 1.000000e+00 : f32
    %236 = vector.broadcast %cst_40 : f32 to vector<2x32xf32>
    %237 = arith.addf %236, %235 : vector<2x32xf32>
    %238 = arith.divf %236, %237 : vector<2x32xf32>
    %239 = vector.extract_strided_slice %219 {offsets = [0, 64], sizes = [2, 32], strides = [1, 1]} : vector<2x96xf32> to vector<2x32xf32>
    %240 = vector.extract_strided_slice %222 {offsets = [0, 64], sizes = [2, 32], strides = [1, 1]} : vector<2x96xf32> to vector<2x32xf32>
    %241 = arith.mulf %230, %240 : vector<2x32xf32>
    %242 = arith.addf %239, %241 : vector<2x32xf32>
    %243 = math.tanh %242 : vector<2x32xf32>
    %cst_41 = arith.constant 1.000000e+00 : f32
    %244 = vector.broadcast %cst_41 : f32 to vector<2x32xf32>
    %245 = arith.subf %244, %238 : vector<2x32xf32>
    %246 = arith.mulf %245, %243 : vector<2x32xf32>
    %247 = arith.mulf %238, %218 : vector<2x32xf32>
    %248 = arith.addf %246, %247 : vector<2x32xf32>
    %c0_42 = arith.constant 0 : index
    %c0_43 = arith.constant 0 : index
    %249 = vector.load %arg7[%c0_42, %c0_43] : memref<32x16xf32, #tpu.memory_space<vmem>>, vector<32x16xf32>
    %cst_44 = arith.constant dense<0.000000e+00> : vector<2x16xf32>
    %250 = tpu.matmul %248, %249, %cst_44 {dimension_numbers = #tpu.dot_dimension_numbers<[1], [0], [0], [1], [0, 0, 1, 1], [], []>} : vector<2x32xf32>, vector<32x16xf32>, vector<2x16xf32> -> vector<2x16xf32>
    %c0_45 = arith.constant 0 : index
    %c0_46 = arith.constant 0 : index
    %251 = vector.load %arg8[%c0_45, %c0_46] : memref<1x16xf32, #tpu.memory_space<vmem>>, vector<1x16xf32>
    %252 = vector.broadcast %251 : vector<1x16xf32> to vector<2x16xf32>
    %253 = arith.addf %250, %252 : vector<2x16xf32>
    %c0_47 = arith.constant 0 : index
    %c0_48 = arith.constant 0 : index
    %254 = vector.load %arg9[%c0_47, %c0_48] : memref<32x16xf32, #tpu.memory_space<vmem>>, vector<32x16xf32>
    %cst_49 = arith.constant dense<0.000000e+00> : vector<2x16xf32>
    %255 = tpu.matmul %248, %254, %cst_49 {dimension_numbers = #tpu.dot_dimension_numbers<[1], [0], [0], [1], [0, 0, 1, 1], [], []>} : vector<2x32xf32>, vector<32x16xf32>, vector<2x16xf32> -> vector<2x16xf32>
    %c0_50 = arith.constant 0 : index
    %c0_51 = arith.constant 0 : index
    %256 = vector.load %arg10[%c0_50, %c0_51] : memref<1x16xf32, #tpu.memory_space<vmem>>, vector<1x16xf32>
    %257 = vector.broadcast %256 : vector<1x16xf32> to vector<2x16xf32>
    %258 = arith.addf %255, %257 : vector<2x16xf32>
    %cst_52 = arith.constant 5.000000e-01 : f32
    %259 = vector.broadcast %cst_52 : f32 to vector<2x16xf32>
    %260 = arith.mulf %259, %258 : vector<2x16xf32>
    %261 = math.exp %260 : vector<2x16xf32>
    %c0_53 = arith.constant 0 : index
    %c0_54 = arith.constant 0 : index
    %262 = vector.load %arg2[%c0_53, %c0_54] : memref<2x16xf32, #tpu.memory_space<vmem>>, vector<2x16xf32>
    %263 = arith.mulf %261, %262 : vector<2x16xf32>
    %264 = arith.addf %253, %263 : vector<2x16xf32>
    %c0_55 = arith.constant 0 : index
    %c0_56 = arith.constant 0 : index
    %265 = vector.load %arg11[%c0_55, %c0_56] : memref<2x16xf32, #tpu.memory_space<vmem>>, vector<2x16xf32>
    tpu.vector_store %arg11[%c0_55, %c0_56], %264 {strides = array<i32>} : memref<2x16xf32, #tpu.memory_space<vmem>>, vector<2x16xf32>,
    %266 = math.exp %258 : vector<2x16xf32>
    %267 = arith.mulf %253, %253 : vector<2x16xf32>
    %268 = arith.addf %266, %267 : vector<2x16xf32>
    %cst_57 = arith.constant 1.000000e+00 : f32
    %269 = vector.broadcast %cst_57 : f32 to vector<2x16xf32>
    %270 = arith.subf %268, %269 : vector<2x16xf32>
    %271 = arith.subf %270, %258 : vector<2x16xf32>
    %272 = vector.shape_cast %271 : vector<2x16xf32> to vector<1x2x16xf32>
    %cst_58 = arith.constant dense<0.000000e+00> : vector<1xf32>
    %273 = vector.multi_reduction <add>, %272, %cst_58 [1, 2] : vector<1x2x16xf32> to vector<1xf32>
    %274 = vector.shape_cast %273 : vector<1xf32> to vector<1x1x1xf32>
    %275 = vector.extract %274[0, 0, 0] : f32 from vector<1x1x1xf32>
    %276 = vector.broadcast %275 : f32 to vector<1x1xf32>
    %cst_59 = arith.constant 5.000000e-01 : f32
    %277 = vector.broadcast %cst_59 : f32 to vector<1x1xf32>
    %278 = arith.mulf %277, %276 : vector<1x1xf32>
    %cst_60 = arith.constant 2.000000e+00 : f32
    %279 = vector.broadcast %cst_60 : f32 to vector<1x1xf32>
    %280 = arith.divf %278, %279 : vector<1x1xf32>
    %c0_61 = arith.constant 0 : index
    %c0_62 = arith.constant 0 : index
    %281 = vector.load %arg12[%c0_61, %c0_62] : memref<1x1xf32, #tpu.memory_space<vmem>>, vector<1x1xf32>
    tpu.vector_store %arg12[%c0_61, %c0_62], %280 {strides = array<i32>} : memref<1x1xf32, #tpu.memory_space<vmem>>, vector<1x1xf32>,
    return
  }
  func.func @transform_0(%arg0: i32) -> (i32, i32) {
    %c0_i32 = arith.constant 0 : i32
    %c0_i32_0 = arith.constant 0 : i32
    %c0_i32_1 = arith.constant 0 : i32
    return %c0_i32, %c0_i32_0 : i32, i32
  }
  func.func @transform_1(%arg0: i32) -> (i32, i32) {
    %c0_i32 = arith.constant 0 : i32
    %c0_i32_0 = arith.constant 0 : i32
    %c0_i32_1 = arith.constant 0 : i32
    return %c0_i32, %c0_i32_0 : i32, i32
  }
  func.func @transform_2(%arg0: i32) -> (i32, i32) {
    %c0_i32 = arith.constant 0 : i32
    %c0_i32_0 = arith.constant 0 : i32
    %c0_i32_1 = arith.constant 0 : i32
    return %c0_i32, %c0_i32_0 : i32, i32
  }
  func.func @transform_3(%arg0: i32) -> (i32, i32) {
    %c0_i32 = arith.constant 0 : i32
    %c0_i32_0 = arith.constant 0 : i32
    %c0_i32_1 = arith.constant 0 : i32
    return %c0_i32, %c0_i32_0 : i32, i32
  }
  func.func @transform_4(%arg0: i32) -> (i32, i32) {
    %c0_i32 = arith.constant 0 : i32
    %c0_i32_0 = arith.constant 0 : i32
    %c0_i32_1 = arith.constant 0 : i32
    return %c0_i32, %c0_i32_0 : i32, i32
  }
  func.func @transform_5(%arg0: i32) -> (i32, i32) {
    %c0_i32 = arith.constant 0 : i32
    %c0_i32_0 = arith.constant 0 : i32
    %c0_i32_1 = arith.constant 0 : i32
    return %c0_i32, %c0_i32_0 : i32, i32
  }
  func.func @transform_6(%arg0: i32) -> (i32, i32) {
    %c0_i32 = arith.constant 0 : i32
    %c0_i32_0 = arith.constant 0 : i32
    %c0_i32_1 = arith.constant 0 : i32
    return %c0_i32, %c0_i32_0 : i32, i32
  }
  func.func @transform_7(%arg0: i32) -> (i32, i32) {
    %c0_i32 = arith.constant 0 : i32
    %c0_i32_0 = arith.constant 0 : i32
    %c0_i32_1 = arith.constant 0 : i32
    return %c0_i32, %c0_i32_0 : i32, i32
  }
  func.func @transform_8(%arg0: i32) -> (i32, i32) {
    %c0_i32 = arith.constant 0 : i32
    %c0_i32_0 = arith.constant 0 : i32
    %c0_i32_1 = arith.constant 0 : i32
    return %c0_i32, %c0_i32_0 : i32, i32
  }
  func.func @transform_9(%arg0: i32) -> (i32, i32) {
    %c0_i32 = arith.constant 0 : i32
    %c0_i32_0 = arith.constant 0 : i32
    %c0_i32_1 = arith.constant 0 : i32
    return %c0_i32, %c0_i32_0 : i32, i32
  }
  func.func @transform_10(%arg0: i32) -> (i32, i32) {
    %c0_i32 = arith.constant 0 : i32
    %c0_i32_0 = arith.constant 0 : i32
    %c0_i32_1 = arith.constant 0 : i32
    return %c0_i32, %c0_i32_0 : i32, i32
  }
  func.func @transform_11(%arg0: i32) -> (i32, i32) {
    %c0_i32 = arith.constant 0 : i32
    %c0_i32_0 = arith.constant 0 : i32
    %c0_i32_1 = arith.constant 0 : i32
    return %c0_i32, %c0_i32_0 : i32, i32
  }
}

module attributes {stable_mosaic.version = 11 : i64} {
  func.func @_decoder_kernel(%arg0: i32, %arg1: memref<16x16xf32, #tpu.memory_space<vmem>>, %arg2: memref<2x16xf32, #tpu.memory_space<vmem>>, %arg3: memref<16x16xf32, #tpu.memory_space<vmem>>, %arg4: memref<16x32xf32, #tpu.memory_space<vmem>>, %arg5: memref<1x32xf32, #tpu.memory_space<vmem>>, %arg6: memref<16x96xf32, #tpu.memory_space<vmem>>, %arg7: memref<16x96xf32, #tpu.memory_space<vmem>>, %arg8: memref<32x96xf32, #tpu.memory_space<vmem>>, %arg9: memref<1x96xf32, #tpu.memory_space<vmem>>, %arg10: memref<1x96xf32, #tpu.memory_space<vmem>>, %arg11: memref<32x16xf32, #tpu.memory_space<vmem>>, %arg12: memref<1x16xf32, #tpu.memory_space<vmem>>, %arg13: memref<1x1xf32, #tpu.memory_space<vmem>>) attributes {dimension_semantics = [#tpu.dimension_semantics<arbitrary>], iteration_bounds = array<i64: 1>, scalar_prefetch = 0 : i64, scratch_operands = 0 : i64, tpu.core_type = #tpu.core_type<tc>, window_params = [{pipeline_mode = #tpu.pipeline_mode<synchronous>, transform_indices = @transform_0, window_bounds = array<i64: 16, 16>}, {pipeline_mode = #tpu.pipeline_mode<synchronous>, transform_indices = @transform_1, window_bounds = array<i64: 2, 16>}, {pipeline_mode = #tpu.pipeline_mode<synchronous>, transform_indices = @transform_2, window_bounds = array<i64: 16, 16>}, {pipeline_mode = #tpu.pipeline_mode<synchronous>, transform_indices = @transform_3, window_bounds = array<i64: 16, 32>}, {pipeline_mode = #tpu.pipeline_mode<synchronous>, transform_indices = @transform_4, window_bounds = array<i64: 1, 32>}, {pipeline_mode = #tpu.pipeline_mode<synchronous>, transform_indices = @transform_5, window_bounds = array<i64: 16, 96>}, {pipeline_mode = #tpu.pipeline_mode<synchronous>, transform_indices = @transform_6, window_bounds = array<i64: 16, 96>}, {pipeline_mode = #tpu.pipeline_mode<synchronous>, transform_indices = @transform_7, window_bounds = array<i64: 32, 96>}, {pipeline_mode = #tpu.pipeline_mode<synchronous>, transform_indices = @transform_8, window_bounds = array<i64: 1, 96>}, {pipeline_mode = #tpu.pipeline_mode<synchronous>, transform_indices = @transform_9, window_bounds = array<i64: 1, 96>}, {pipeline_mode = #tpu.pipeline_mode<synchronous>, transform_indices = @transform_10, window_bounds = array<i64: 32, 16>}, {pipeline_mode = #tpu.pipeline_mode<synchronous>, transform_indices = @transform_11, window_bounds = array<i64: 1, 16>}, {pipeline_mode = #tpu.pipeline_mode<synchronous>, transform_indices = @transform_12, window_bounds = array<i64: 1, 1>}]} {
    %c0 = arith.constant 0 : index
    %c0_0 = arith.constant 0 : index
    %0 = vector.load %arg2[%c0, %c0_0] : memref<2x16xf32, #tpu.memory_space<vmem>>, vector<2x16xf32>
    %c0_1 = arith.constant 0 : index
    %c0_2 = arith.constant 0 : index
    %1 = vector.load %arg1[%c0_1, %c0_2] : memref<16x16xf32, #tpu.memory_space<vmem>>, vector<16x16xf32>
    %c0_3 = arith.constant 0 : index
    %c0_4 = arith.constant 0 : index
    %2 = vector.load %arg6[%c0_3, %c0_4] : memref<16x96xf32, #tpu.memory_space<vmem>>, vector<16x96xf32>
    %cst = arith.constant dense<0.000000e+00> : vector<16x96xf32>
    %3 = tpu.matmul %1, %2, %cst {dimension_numbers = #tpu.dot_dimension_numbers<[1], [0], [0], [1], [0, 0, 1, 1], [], []>} : vector<16x16xf32>, vector<16x96xf32>, vector<16x96xf32> -> vector<16x96xf32>
    %c0_5 = arith.constant 0 : index
    %c0_6 = arith.constant 0 : index
    %4 = vector.load %arg9[%c0_5, %c0_6] : memref<1x96xf32, #tpu.memory_space<vmem>>, vector<1x96xf32>
    %5 = vector.broadcast %4 : vector<1x96xf32> to vector<16x96xf32>
    %6 = arith.addf %3, %5 : vector<16x96xf32>
    %c0_7 = arith.constant 0 : index
    %c0_8 = arith.constant 0 : index
    %7 = vector.load %arg7[%c0_7, %c0_8] : memref<16x96xf32, #tpu.memory_space<vmem>>, vector<16x96xf32>
    %cst_9 = arith.constant dense<0.000000e+00> : vector<2x96xf32>
    %8 = tpu.matmul %0, %7, %cst_9 {dimension_numbers = #tpu.dot_dimension_numbers<[1], [0], [0], [1], [0, 0, 1, 1], [], []>} : vector<2x16xf32>, vector<16x96xf32>, vector<2x96xf32> -> vector<2x96xf32>
    %c0_10 = arith.constant 0 : index
    %c0_11 = arith.constant 0 : index
    %9 = vector.load %arg4[%c0_10, %c0_11] : memref<16x32xf32, #tpu.memory_space<vmem>>, vector<16x32xf32>
    %cst_12 = arith.constant dense<0.000000e+00> : vector<2x32xf32>
    %10 = tpu.matmul %0, %9, %cst_12 {dimension_numbers = #tpu.dot_dimension_numbers<[1], [0], [0], [1], [0, 0, 1, 1], [], []>} : vector<2x16xf32>, vector<16x32xf32>, vector<2x32xf32> -> vector<2x32xf32>
    %c0_13 = arith.constant 0 : index
    %c0_14 = arith.constant 0 : index
    %11 = vector.load %arg5[%c0_13, %c0_14] : memref<1x32xf32, #tpu.memory_space<vmem>>, vector<1x32xf32>
    %12 = vector.broadcast %11 : vector<1x32xf32> to vector<2x32xf32>
    %13 = arith.addf %10, %12 : vector<2x32xf32>
    %c0_15 = arith.constant 0 : index
    %c0_16 = arith.constant 0 : index
    %14 = vector.load %arg8[%c0_15, %c0_16] : memref<32x96xf32, #tpu.memory_space<vmem>>, vector<32x96xf32>
    %c0_17 = arith.constant 0 : index
    %c0_18 = arith.constant 0 : index
    %15 = vector.load %arg10[%c0_17, %c0_18] : memref<1x96xf32, #tpu.memory_space<vmem>>, vector<1x96xf32>
    %16 = vector.extract_strided_slice %6 {offsets = [0, 0], sizes = [2, 96], strides = [1, 1]} : vector<16x96xf32> to vector<2x96xf32>
    %17 = arith.addf %16, %8 : vector<2x96xf32>
    %cst_19 = arith.constant dense<0.000000e+00> : vector<2x96xf32>
    %18 = tpu.matmul %13, %14, %cst_19 {dimension_numbers = #tpu.dot_dimension_numbers<[1], [0], [0], [1], [0, 0, 1, 1], [], []>} : vector<2x32xf32>, vector<32x96xf32>, vector<2x96xf32> -> vector<2x96xf32>
    %19 = vector.broadcast %15 : vector<1x96xf32> to vector<2x96xf32>
    %20 = arith.addf %18, %19 : vector<2x96xf32>
    %21 = vector.extract_strided_slice %17 {offsets = [0, 0], sizes = [2, 32], strides = [1, 1]} : vector<2x96xf32> to vector<2x32xf32>
    %22 = vector.extract_strided_slice %20 {offsets = [0, 0], sizes = [2, 32], strides = [1, 1]} : vector<2x96xf32> to vector<2x32xf32>
    %23 = arith.addf %21, %22 : vector<2x32xf32>
    %24 = arith.negf %23 : vector<2x32xf32>
    %25 = math.exp %24 : vector<2x32xf32>
    %cst_20 = arith.constant 1.000000e+00 : f32
    %26 = vector.broadcast %cst_20 : f32 to vector<2x32xf32>
    %27 = arith.addf %26, %25 : vector<2x32xf32>
    %28 = arith.divf %26, %27 : vector<2x32xf32>
    %29 = vector.extract_strided_slice %17 {offsets = [0, 32], sizes = [2, 32], strides = [1, 1]} : vector<2x96xf32> to vector<2x32xf32>
    %30 = vector.extract_strided_slice %20 {offsets = [0, 32], sizes = [2, 32], strides = [1, 1]} : vector<2x96xf32> to vector<2x32xf32>
    %31 = arith.addf %29, %30 : vector<2x32xf32>
    %32 = arith.negf %31 : vector<2x32xf32>
    %33 = math.exp %32 : vector<2x32xf32>
    %cst_21 = arith.constant 1.000000e+00 : f32
    %34 = vector.broadcast %cst_21 : f32 to vector<2x32xf32>
    %35 = arith.addf %34, %33 : vector<2x32xf32>
    %36 = arith.divf %34, %35 : vector<2x32xf32>
    %37 = vector.extract_strided_slice %17 {offsets = [0, 64], sizes = [2, 32], strides = [1, 1]} : vector<2x96xf32> to vector<2x32xf32>
    %38 = vector.extract_strided_slice %20 {offsets = [0, 64], sizes = [2, 32], strides = [1, 1]} : vector<2x96xf32> to vector<2x32xf32>
    %39 = arith.mulf %28, %38 : vector<2x32xf32>
    %40 = arith.addf %37, %39 : vector<2x32xf32>
    %41 = math.tanh %40 : vector<2x32xf32>
    %cst_22 = arith.constant 1.000000e+00 : f32
    %42 = vector.broadcast %cst_22 : f32 to vector<2x32xf32>
    %43 = arith.subf %42, %36 : vector<2x32xf32>
    %44 = arith.mulf %43, %41 : vector<2x32xf32>
    %45 = arith.mulf %36, %13 : vector<2x32xf32>
    %46 = arith.addf %44, %45 : vector<2x32xf32>
    %47 = vector.extract_strided_slice %6 {offsets = [2, 0], sizes = [2, 96], strides = [1, 1]} : vector<16x96xf32> to vector<2x96xf32>
    %48 = arith.addf %47, %8 : vector<2x96xf32>
    %cst_23 = arith.constant dense<0.000000e+00> : vector<2x96xf32>
    %49 = tpu.matmul %46, %14, %cst_23 {dimension_numbers = #tpu.dot_dimension_numbers<[1], [0], [0], [1], [0, 0, 1, 1], [], []>} : vector<2x32xf32>, vector<32x96xf32>, vector<2x96xf32> -> vector<2x96xf32>
    %50 = vector.broadcast %15 : vector<1x96xf32> to vector<2x96xf32>
    %51 = arith.addf %49, %50 : vector<2x96xf32>
    %52 = vector.extract_strided_slice %48 {offsets = [0, 0], sizes = [2, 32], strides = [1, 1]} : vector<2x96xf32> to vector<2x32xf32>
    %53 = vector.extract_strided_slice %51 {offsets = [0, 0], sizes = [2, 32], strides = [1, 1]} : vector<2x96xf32> to vector<2x32xf32>
    %54 = arith.addf %52, %53 : vector<2x32xf32>
    %55 = arith.negf %54 : vector<2x32xf32>
    %56 = math.exp %55 : vector<2x32xf32>
    %cst_24 = arith.constant 1.000000e+00 : f32
    %57 = vector.broadcast %cst_24 : f32 to vector<2x32xf32>
    %58 = arith.addf %57, %56 : vector<2x32xf32>
    %59 = arith.divf %57, %58 : vector<2x32xf32>
    %60 = vector.extract_strided_slice %48 {offsets = [0, 32], sizes = [2, 32], strides = [1, 1]} : vector<2x96xf32> to vector<2x32xf32>
    %61 = vector.extract_strided_slice %51 {offsets = [0, 32], sizes = [2, 32], strides = [1, 1]} : vector<2x96xf32> to vector<2x32xf32>
    %62 = arith.addf %60, %61 : vector<2x32xf32>
    %63 = arith.negf %62 : vector<2x32xf32>
    %64 = math.exp %63 : vector<2x32xf32>
    %cst_25 = arith.constant 1.000000e+00 : f32
    %65 = vector.broadcast %cst_25 : f32 to vector<2x32xf32>
    %66 = arith.addf %65, %64 : vector<2x32xf32>
    %67 = arith.divf %65, %66 : vector<2x32xf32>
    %68 = vector.extract_strided_slice %48 {offsets = [0, 64], sizes = [2, 32], strides = [1, 1]} : vector<2x96xf32> to vector<2x32xf32>
    %69 = vector.extract_strided_slice %51 {offsets = [0, 64], sizes = [2, 32], strides = [1, 1]} : vector<2x96xf32> to vector<2x32xf32>
    %70 = arith.mulf %59, %69 : vector<2x32xf32>
    %71 = arith.addf %68, %70 : vector<2x32xf32>
    %72 = math.tanh %71 : vector<2x32xf32>
    %cst_26 = arith.constant 1.000000e+00 : f32
    %73 = vector.broadcast %cst_26 : f32 to vector<2x32xf32>
    %74 = arith.subf %73, %67 : vector<2x32xf32>
    %75 = arith.mulf %74, %72 : vector<2x32xf32>
    %76 = arith.mulf %67, %46 : vector<2x32xf32>
    %77 = arith.addf %75, %76 : vector<2x32xf32>
    %78 = vector.extract_strided_slice %6 {offsets = [4, 0], sizes = [2, 96], strides = [1, 1]} : vector<16x96xf32> to vector<2x96xf32>
    %79 = arith.addf %78, %8 : vector<2x96xf32>
    %cst_27 = arith.constant dense<0.000000e+00> : vector<2x96xf32>
    %80 = tpu.matmul %77, %14, %cst_27 {dimension_numbers = #tpu.dot_dimension_numbers<[1], [0], [0], [1], [0, 0, 1, 1], [], []>} : vector<2x32xf32>, vector<32x96xf32>, vector<2x96xf32> -> vector<2x96xf32>
    %81 = vector.broadcast %15 : vector<1x96xf32> to vector<2x96xf32>
    %82 = arith.addf %80, %81 : vector<2x96xf32>
    %83 = vector.extract_strided_slice %79 {offsets = [0, 0], sizes = [2, 32], strides = [1, 1]} : vector<2x96xf32> to vector<2x32xf32>
    %84 = vector.extract_strided_slice %82 {offsets = [0, 0], sizes = [2, 32], strides = [1, 1]} : vector<2x96xf32> to vector<2x32xf32>
    %85 = arith.addf %83, %84 : vector<2x32xf32>
    %86 = arith.negf %85 : vector<2x32xf32>
    %87 = math.exp %86 : vector<2x32xf32>
    %cst_28 = arith.constant 1.000000e+00 : f32
    %88 = vector.broadcast %cst_28 : f32 to vector<2x32xf32>
    %89 = arith.addf %88, %87 : vector<2x32xf32>
    %90 = arith.divf %88, %89 : vector<2x32xf32>
    %91 = vector.extract_strided_slice %79 {offsets = [0, 32], sizes = [2, 32], strides = [1, 1]} : vector<2x96xf32> to vector<2x32xf32>
    %92 = vector.extract_strided_slice %82 {offsets = [0, 32], sizes = [2, 32], strides = [1, 1]} : vector<2x96xf32> to vector<2x32xf32>
    %93 = arith.addf %91, %92 : vector<2x32xf32>
    %94 = arith.negf %93 : vector<2x32xf32>
    %95 = math.exp %94 : vector<2x32xf32>
    %cst_29 = arith.constant 1.000000e+00 : f32
    %96 = vector.broadcast %cst_29 : f32 to vector<2x32xf32>
    %97 = arith.addf %96, %95 : vector<2x32xf32>
    %98 = arith.divf %96, %97 : vector<2x32xf32>
    %99 = vector.extract_strided_slice %79 {offsets = [0, 64], sizes = [2, 32], strides = [1, 1]} : vector<2x96xf32> to vector<2x32xf32>
    %100 = vector.extract_strided_slice %82 {offsets = [0, 64], sizes = [2, 32], strides = [1, 1]} : vector<2x96xf32> to vector<2x32xf32>
    %101 = arith.mulf %90, %100 : vector<2x32xf32>
    %102 = arith.addf %99, %101 : vector<2x32xf32>
    %103 = math.tanh %102 : vector<2x32xf32>
    %cst_30 = arith.constant 1.000000e+00 : f32
    %104 = vector.broadcast %cst_30 : f32 to vector<2x32xf32>
    %105 = arith.subf %104, %98 : vector<2x32xf32>
    %106 = arith.mulf %105, %103 : vector<2x32xf32>
    %107 = arith.mulf %98, %77 : vector<2x32xf32>
    %108 = arith.addf %106, %107 : vector<2x32xf32>
    %109 = vector.extract_strided_slice %6 {offsets = [6, 0], sizes = [2, 96], strides = [1, 1]} : vector<16x96xf32> to vector<2x96xf32>
    %110 = arith.addf %109, %8 : vector<2x96xf32>
    %cst_31 = arith.constant dense<0.000000e+00> : vector<2x96xf32>
    %111 = tpu.matmul %108, %14, %cst_31 {dimension_numbers = #tpu.dot_dimension_numbers<[1], [0], [0], [1], [0, 0, 1, 1], [], []>} : vector<2x32xf32>, vector<32x96xf32>, vector<2x96xf32> -> vector<2x96xf32>
    %112 = vector.broadcast %15 : vector<1x96xf32> to vector<2x96xf32>
    %113 = arith.addf %111, %112 : vector<2x96xf32>
    %114 = vector.extract_strided_slice %110 {offsets = [0, 0], sizes = [2, 32], strides = [1, 1]} : vector<2x96xf32> to vector<2x32xf32>
    %115 = vector.extract_strided_slice %113 {offsets = [0, 0], sizes = [2, 32], strides = [1, 1]} : vector<2x96xf32> to vector<2x32xf32>
    %116 = arith.addf %114, %115 : vector<2x32xf32>
    %117 = arith.negf %116 : vector<2x32xf32>
    %118 = math.exp %117 : vector<2x32xf32>
    %cst_32 = arith.constant 1.000000e+00 : f32
    %119 = vector.broadcast %cst_32 : f32 to vector<2x32xf32>
    %120 = arith.addf %119, %118 : vector<2x32xf32>
    %121 = arith.divf %119, %120 : vector<2x32xf32>
    %122 = vector.extract_strided_slice %110 {offsets = [0, 32], sizes = [2, 32], strides = [1, 1]} : vector<2x96xf32> to vector<2x32xf32>
    %123 = vector.extract_strided_slice %113 {offsets = [0, 32], sizes = [2, 32], strides = [1, 1]} : vector<2x96xf32> to vector<2x32xf32>
    %124 = arith.addf %122, %123 : vector<2x32xf32>
    %125 = arith.negf %124 : vector<2x32xf32>
    %126 = math.exp %125 : vector<2x32xf32>
    %cst_33 = arith.constant 1.000000e+00 : f32
    %127 = vector.broadcast %cst_33 : f32 to vector<2x32xf32>
    %128 = arith.addf %127, %126 : vector<2x32xf32>
    %129 = arith.divf %127, %128 : vector<2x32xf32>
    %130 = vector.extract_strided_slice %110 {offsets = [0, 64], sizes = [2, 32], strides = [1, 1]} : vector<2x96xf32> to vector<2x32xf32>
    %131 = vector.extract_strided_slice %113 {offsets = [0, 64], sizes = [2, 32], strides = [1, 1]} : vector<2x96xf32> to vector<2x32xf32>
    %132 = arith.mulf %121, %131 : vector<2x32xf32>
    %133 = arith.addf %130, %132 : vector<2x32xf32>
    %134 = math.tanh %133 : vector<2x32xf32>
    %cst_34 = arith.constant 1.000000e+00 : f32
    %135 = vector.broadcast %cst_34 : f32 to vector<2x32xf32>
    %136 = arith.subf %135, %129 : vector<2x32xf32>
    %137 = arith.mulf %136, %134 : vector<2x32xf32>
    %138 = arith.mulf %129, %108 : vector<2x32xf32>
    %139 = arith.addf %137, %138 : vector<2x32xf32>
    %140 = vector.extract_strided_slice %6 {offsets = [8, 0], sizes = [2, 96], strides = [1, 1]} : vector<16x96xf32> to vector<2x96xf32>
    %141 = arith.addf %140, %8 : vector<2x96xf32>
    %cst_35 = arith.constant dense<0.000000e+00> : vector<2x96xf32>
    %142 = tpu.matmul %139, %14, %cst_35 {dimension_numbers = #tpu.dot_dimension_numbers<[1], [0], [0], [1], [0, 0, 1, 1], [], []>} : vector<2x32xf32>, vector<32x96xf32>, vector<2x96xf32> -> vector<2x96xf32>
    %143 = vector.broadcast %15 : vector<1x96xf32> to vector<2x96xf32>
    %144 = arith.addf %142, %143 : vector<2x96xf32>
    %145 = vector.extract_strided_slice %141 {offsets = [0, 0], sizes = [2, 32], strides = [1, 1]} : vector<2x96xf32> to vector<2x32xf32>
    %146 = vector.extract_strided_slice %144 {offsets = [0, 0], sizes = [2, 32], strides = [1, 1]} : vector<2x96xf32> to vector<2x32xf32>
    %147 = arith.addf %145, %146 : vector<2x32xf32>
    %148 = arith.negf %147 : vector<2x32xf32>
    %149 = math.exp %148 : vector<2x32xf32>
    %cst_36 = arith.constant 1.000000e+00 : f32
    %150 = vector.broadcast %cst_36 : f32 to vector<2x32xf32>
    %151 = arith.addf %150, %149 : vector<2x32xf32>
    %152 = arith.divf %150, %151 : vector<2x32xf32>
    %153 = vector.extract_strided_slice %141 {offsets = [0, 32], sizes = [2, 32], strides = [1, 1]} : vector<2x96xf32> to vector<2x32xf32>
    %154 = vector.extract_strided_slice %144 {offsets = [0, 32], sizes = [2, 32], strides = [1, 1]} : vector<2x96xf32> to vector<2x32xf32>
    %155 = arith.addf %153, %154 : vector<2x32xf32>
    %156 = arith.negf %155 : vector<2x32xf32>
    %157 = math.exp %156 : vector<2x32xf32>
    %cst_37 = arith.constant 1.000000e+00 : f32
    %158 = vector.broadcast %cst_37 : f32 to vector<2x32xf32>
    %159 = arith.addf %158, %157 : vector<2x32xf32>
    %160 = arith.divf %158, %159 : vector<2x32xf32>
    %161 = vector.extract_strided_slice %141 {offsets = [0, 64], sizes = [2, 32], strides = [1, 1]} : vector<2x96xf32> to vector<2x32xf32>
    %162 = vector.extract_strided_slice %144 {offsets = [0, 64], sizes = [2, 32], strides = [1, 1]} : vector<2x96xf32> to vector<2x32xf32>
    %163 = arith.mulf %152, %162 : vector<2x32xf32>
    %164 = arith.addf %161, %163 : vector<2x32xf32>
    %165 = math.tanh %164 : vector<2x32xf32>
    %cst_38 = arith.constant 1.000000e+00 : f32
    %166 = vector.broadcast %cst_38 : f32 to vector<2x32xf32>
    %167 = arith.subf %166, %160 : vector<2x32xf32>
    %168 = arith.mulf %167, %165 : vector<2x32xf32>
    %169 = arith.mulf %160, %139 : vector<2x32xf32>
    %170 = arith.addf %168, %169 : vector<2x32xf32>
    %171 = vector.extract_strided_slice %6 {offsets = [10, 0], sizes = [2, 96], strides = [1, 1]} : vector<16x96xf32> to vector<2x96xf32>
    %172 = arith.addf %171, %8 : vector<2x96xf32>
    %cst_39 = arith.constant dense<0.000000e+00> : vector<2x96xf32>
    %173 = tpu.matmul %170, %14, %cst_39 {dimension_numbers = #tpu.dot_dimension_numbers<[1], [0], [0], [1], [0, 0, 1, 1], [], []>} : vector<2x32xf32>, vector<32x96xf32>, vector<2x96xf32> -> vector<2x96xf32>
    %174 = vector.broadcast %15 : vector<1x96xf32> to vector<2x96xf32>
    %175 = arith.addf %173, %174 : vector<2x96xf32>
    %176 = vector.extract_strided_slice %172 {offsets = [0, 0], sizes = [2, 32], strides = [1, 1]} : vector<2x96xf32> to vector<2x32xf32>
    %177 = vector.extract_strided_slice %175 {offsets = [0, 0], sizes = [2, 32], strides = [1, 1]} : vector<2x96xf32> to vector<2x32xf32>
    %178 = arith.addf %176, %177 : vector<2x32xf32>
    %179 = arith.negf %178 : vector<2x32xf32>
    %180 = math.exp %179 : vector<2x32xf32>
    %cst_40 = arith.constant 1.000000e+00 : f32
    %181 = vector.broadcast %cst_40 : f32 to vector<2x32xf32>
    %182 = arith.addf %181, %180 : vector<2x32xf32>
    %183 = arith.divf %181, %182 : vector<2x32xf32>
    %184 = vector.extract_strided_slice %172 {offsets = [0, 32], sizes = [2, 32], strides = [1, 1]} : vector<2x96xf32> to vector<2x32xf32>
    %185 = vector.extract_strided_slice %175 {offsets = [0, 32], sizes = [2, 32], strides = [1, 1]} : vector<2x96xf32> to vector<2x32xf32>
    %186 = arith.addf %184, %185 : vector<2x32xf32>
    %187 = arith.negf %186 : vector<2x32xf32>
    %188 = math.exp %187 : vector<2x32xf32>
    %cst_41 = arith.constant 1.000000e+00 : f32
    %189 = vector.broadcast %cst_41 : f32 to vector<2x32xf32>
    %190 = arith.addf %189, %188 : vector<2x32xf32>
    %191 = arith.divf %189, %190 : vector<2x32xf32>
    %192 = vector.extract_strided_slice %172 {offsets = [0, 64], sizes = [2, 32], strides = [1, 1]} : vector<2x96xf32> to vector<2x32xf32>
    %193 = vector.extract_strided_slice %175 {offsets = [0, 64], sizes = [2, 32], strides = [1, 1]} : vector<2x96xf32> to vector<2x32xf32>
    %194 = arith.mulf %183, %193 : vector<2x32xf32>
    %195 = arith.addf %192, %194 : vector<2x32xf32>
    %196 = math.tanh %195 : vector<2x32xf32>
    %cst_42 = arith.constant 1.000000e+00 : f32
    %197 = vector.broadcast %cst_42 : f32 to vector<2x32xf32>
    %198 = arith.subf %197, %191 : vector<2x32xf32>
    %199 = arith.mulf %198, %196 : vector<2x32xf32>
    %200 = arith.mulf %191, %170 : vector<2x32xf32>
    %201 = arith.addf %199, %200 : vector<2x32xf32>
    %202 = vector.extract_strided_slice %6 {offsets = [12, 0], sizes = [2, 96], strides = [1, 1]} : vector<16x96xf32> to vector<2x96xf32>
    %203 = arith.addf %202, %8 : vector<2x96xf32>
    %cst_43 = arith.constant dense<0.000000e+00> : vector<2x96xf32>
    %204 = tpu.matmul %201, %14, %cst_43 {dimension_numbers = #tpu.dot_dimension_numbers<[1], [0], [0], [1], [0, 0, 1, 1], [], []>} : vector<2x32xf32>, vector<32x96xf32>, vector<2x96xf32> -> vector<2x96xf32>
    %205 = vector.broadcast %15 : vector<1x96xf32> to vector<2x96xf32>
    %206 = arith.addf %204, %205 : vector<2x96xf32>
    %207 = vector.extract_strided_slice %203 {offsets = [0, 0], sizes = [2, 32], strides = [1, 1]} : vector<2x96xf32> to vector<2x32xf32>
    %208 = vector.extract_strided_slice %206 {offsets = [0, 0], sizes = [2, 32], strides = [1, 1]} : vector<2x96xf32> to vector<2x32xf32>
    %209 = arith.addf %207, %208 : vector<2x32xf32>
    %210 = arith.negf %209 : vector<2x32xf32>
    %211 = math.exp %210 : vector<2x32xf32>
    %cst_44 = arith.constant 1.000000e+00 : f32
    %212 = vector.broadcast %cst_44 : f32 to vector<2x32xf32>
    %213 = arith.addf %212, %211 : vector<2x32xf32>
    %214 = arith.divf %212, %213 : vector<2x32xf32>
    %215 = vector.extract_strided_slice %203 {offsets = [0, 32], sizes = [2, 32], strides = [1, 1]} : vector<2x96xf32> to vector<2x32xf32>
    %216 = vector.extract_strided_slice %206 {offsets = [0, 32], sizes = [2, 32], strides = [1, 1]} : vector<2x96xf32> to vector<2x32xf32>
    %217 = arith.addf %215, %216 : vector<2x32xf32>
    %218 = arith.negf %217 : vector<2x32xf32>
    %219 = math.exp %218 : vector<2x32xf32>
    %cst_45 = arith.constant 1.000000e+00 : f32
    %220 = vector.broadcast %cst_45 : f32 to vector<2x32xf32>
    %221 = arith.addf %220, %219 : vector<2x32xf32>
    %222 = arith.divf %220, %221 : vector<2x32xf32>
    %223 = vector.extract_strided_slice %203 {offsets = [0, 64], sizes = [2, 32], strides = [1, 1]} : vector<2x96xf32> to vector<2x32xf32>
    %224 = vector.extract_strided_slice %206 {offsets = [0, 64], sizes = [2, 32], strides = [1, 1]} : vector<2x96xf32> to vector<2x32xf32>
    %225 = arith.mulf %214, %224 : vector<2x32xf32>
    %226 = arith.addf %223, %225 : vector<2x32xf32>
    %227 = math.tanh %226 : vector<2x32xf32>
    %cst_46 = arith.constant 1.000000e+00 : f32
    %228 = vector.broadcast %cst_46 : f32 to vector<2x32xf32>
    %229 = arith.subf %228, %222 : vector<2x32xf32>
    %230 = arith.mulf %229, %227 : vector<2x32xf32>
    %231 = arith.mulf %222, %201 : vector<2x32xf32>
    %232 = arith.addf %230, %231 : vector<2x32xf32>
    %233 = vector.extract_strided_slice %6 {offsets = [14, 0], sizes = [2, 96], strides = [1, 1]} : vector<16x96xf32> to vector<2x96xf32>
    %234 = arith.addf %233, %8 : vector<2x96xf32>
    %cst_47 = arith.constant dense<0.000000e+00> : vector<2x96xf32>
    %235 = tpu.matmul %232, %14, %cst_47 {dimension_numbers = #tpu.dot_dimension_numbers<[1], [0], [0], [1], [0, 0, 1, 1], [], []>} : vector<2x32xf32>, vector<32x96xf32>, vector<2x96xf32> -> vector<2x96xf32>
    %236 = vector.broadcast %15 : vector<1x96xf32> to vector<2x96xf32>
    %237 = arith.addf %235, %236 : vector<2x96xf32>
    %238 = vector.extract_strided_slice %234 {offsets = [0, 0], sizes = [2, 32], strides = [1, 1]} : vector<2x96xf32> to vector<2x32xf32>
    %239 = vector.extract_strided_slice %237 {offsets = [0, 0], sizes = [2, 32], strides = [1, 1]} : vector<2x96xf32> to vector<2x32xf32>
    %240 = arith.addf %238, %239 : vector<2x32xf32>
    %241 = arith.negf %240 : vector<2x32xf32>
    %242 = math.exp %241 : vector<2x32xf32>
    %cst_48 = arith.constant 1.000000e+00 : f32
    %243 = vector.broadcast %cst_48 : f32 to vector<2x32xf32>
    %244 = arith.addf %243, %242 : vector<2x32xf32>
    %245 = arith.divf %243, %244 : vector<2x32xf32>
    %246 = vector.extract_strided_slice %234 {offsets = [0, 32], sizes = [2, 32], strides = [1, 1]} : vector<2x96xf32> to vector<2x32xf32>
    %247 = vector.extract_strided_slice %237 {offsets = [0, 32], sizes = [2, 32], strides = [1, 1]} : vector<2x96xf32> to vector<2x32xf32>
    %248 = arith.addf %246, %247 : vector<2x32xf32>
    %249 = arith.negf %248 : vector<2x32xf32>
    %250 = math.exp %249 : vector<2x32xf32>
    %cst_49 = arith.constant 1.000000e+00 : f32
    %251 = vector.broadcast %cst_49 : f32 to vector<2x32xf32>
    %252 = arith.addf %251, %250 : vector<2x32xf32>
    %253 = arith.divf %251, %252 : vector<2x32xf32>
    %254 = vector.extract_strided_slice %234 {offsets = [0, 64], sizes = [2, 32], strides = [1, 1]} : vector<2x96xf32> to vector<2x32xf32>
    %255 = vector.extract_strided_slice %237 {offsets = [0, 64], sizes = [2, 32], strides = [1, 1]} : vector<2x96xf32> to vector<2x32xf32>
    %256 = arith.mulf %245, %255 : vector<2x32xf32>
    %257 = arith.addf %254, %256 : vector<2x32xf32>
    %258 = math.tanh %257 : vector<2x32xf32>
    %cst_50 = arith.constant 1.000000e+00 : f32
    %259 = vector.broadcast %cst_50 : f32 to vector<2x32xf32>
    %260 = arith.subf %259, %253 : vector<2x32xf32>
    %261 = arith.mulf %260, %258 : vector<2x32xf32>
    %262 = arith.mulf %253, %232 : vector<2x32xf32>
    %263 = arith.addf %261, %262 : vector<2x32xf32>
    %264 = tpu.concatenate %46, %77, %108, %139, %170, %201, %232, %263 in 0 : vector<2x32xf32>, vector<2x32xf32>, vector<2x32xf32>, vector<2x32xf32>, vector<2x32xf32>, vector<2x32xf32>, vector<2x32xf32>, vector<2x32xf32> -> vector<16x32xf32>
    %c0_51 = arith.constant 0 : index
    %c0_52 = arith.constant 0 : index
    %265 = vector.load %arg11[%c0_51, %c0_52] : memref<32x16xf32, #tpu.memory_space<vmem>>, vector<32x16xf32>
    %cst_53 = arith.constant dense<0.000000e+00> : vector<16x16xf32>
    %266 = tpu.matmul %264, %265, %cst_53 {dimension_numbers = #tpu.dot_dimension_numbers<[1], [0], [0], [1], [0, 0, 1, 1], [], []>} : vector<16x32xf32>, vector<32x16xf32>, vector<16x16xf32> -> vector<16x16xf32>
    %c0_54 = arith.constant 0 : index
    %c0_55 = arith.constant 0 : index
    %267 = vector.load %arg12[%c0_54, %c0_55] : memref<1x16xf32, #tpu.memory_space<vmem>>, vector<1x16xf32>
    %268 = vector.broadcast %267 : vector<1x16xf32> to vector<16x16xf32>
    %269 = arith.addf %266, %268 : vector<16x16xf32>
    %c0_56 = arith.constant 0 : index
    %c0_57 = arith.constant 0 : index
    %270 = vector.load %arg3[%c0_56, %c0_57] : memref<16x16xf32, #tpu.memory_space<vmem>>, vector<16x16xf32>
    %cst_58 = arith.constant dense<0xFF800000> : vector<16xf32>
    %271 = vector.multi_reduction <maximumf>, %269, %cst_58 [1] : vector<16x16xf32> to vector<16xf32>
    %272 = vector.shape_cast %271 : vector<16xf32> to vector<16x1xf32>
    %273 = vector.broadcast %272 : vector<16x1xf32> to vector<16x16xf32>
    %274 = arith.subf %269, %273 : vector<16x16xf32>
    %275 = math.exp %274 : vector<16x16xf32>
    %cst_59 = arith.constant dense<0.000000e+00> : vector<16xf32>
    %276 = vector.multi_reduction <add>, %275, %cst_59 [1] : vector<16x16xf32> to vector<16xf32>
    %277 = vector.shape_cast %276 : vector<16xf32> to vector<16x1xf32>
    %278 = math.log %277 : vector<16x1xf32>
    %279 = arith.addf %272, %278 : vector<16x1xf32>
    %cst_60 = arith.constant dense<0.000000e+00> : vector<16xf32>
    %280 = vector.multi_reduction <add>, %270, %cst_60 [1] : vector<16x16xf32> to vector<16xf32>
    %281 = vector.shape_cast %280 : vector<16xf32> to vector<16x1xf32>
    %282 = arith.mulf %270, %269 : vector<16x16xf32>
    %cst_61 = arith.constant dense<0.000000e+00> : vector<16xf32>
    %283 = vector.multi_reduction <add>, %282, %cst_61 [1] : vector<16x16xf32> to vector<16xf32>
    %284 = vector.shape_cast %283 : vector<16xf32> to vector<16x1xf32>
    %285 = arith.mulf %281, %279 : vector<16x1xf32>
    %286 = arith.subf %285, %284 : vector<16x1xf32>
    %287 = vector.shape_cast %286 : vector<16x1xf32> to vector<1x16x1xf32>
    %cst_62 = arith.constant dense<0.000000e+00> : vector<1xf32>
    %288 = vector.multi_reduction <add>, %287, %cst_62 [1, 2] : vector<1x16x1xf32> to vector<1xf32>
    %289 = vector.shape_cast %288 : vector<1xf32> to vector<1x1x1xf32>
    %290 = vector.extract %289[0, 0, 0] : f32 from vector<1x1x1xf32>
    %291 = vector.broadcast %290 : f32 to vector<1x1xf32>
    %292 = vector.shape_cast %281 : vector<16x1xf32> to vector<1x16x1xf32>
    %cst_63 = arith.constant dense<0.000000e+00> : vector<1xf32>
    %293 = vector.multi_reduction <add>, %292, %cst_63 [1, 2] : vector<1x16x1xf32> to vector<1xf32>
    %294 = vector.shape_cast %293 : vector<1xf32> to vector<1x1x1xf32>
    %295 = vector.extract %294[0, 0, 0] : f32 from vector<1x1x1xf32>
    %296 = vector.broadcast %295 : f32 to vector<1x1xf32>
    %cst_64 = arith.constant 1.000000e+00 : f32
    %297 = vector.broadcast %cst_64 : f32 to vector<1x1xf32>
    %298 = arith.maximumf %296, %297 : vector<1x1xf32>
    %299 = arith.divf %291, %298 : vector<1x1xf32>
    %c0_65 = arith.constant 0 : index
    %c0_66 = arith.constant 0 : index
    %300 = vector.load %arg13[%c0_65, %c0_66] : memref<1x1xf32, #tpu.memory_space<vmem>>, vector<1x1xf32>
    tpu.vector_store %arg13[%c0_65, %c0_66], %299 {strides = array<i32>} : memref<1x1xf32, #tpu.memory_space<vmem>>, vector<1x1xf32>,
    return
  }
  func.func @transform_0(%arg0: i32) -> (i32, i32) {
    %c0_i32 = arith.constant 0 : i32
    %c0_i32_0 = arith.constant 0 : i32
    %c0_i32_1 = arith.constant 0 : i32
    return %c0_i32, %c0_i32_0 : i32, i32
  }
  func.func @transform_1(%arg0: i32) -> (i32, i32) {
    %c0_i32 = arith.constant 0 : i32
    %c0_i32_0 = arith.constant 0 : i32
    %c0_i32_1 = arith.constant 0 : i32
    return %c0_i32, %c0_i32_0 : i32, i32
  }
  func.func @transform_2(%arg0: i32) -> (i32, i32) {
    %c0_i32 = arith.constant 0 : i32
    %c0_i32_0 = arith.constant 0 : i32
    %c0_i32_1 = arith.constant 0 : i32
    return %c0_i32, %c0_i32_0 : i32, i32
  }
  func.func @transform_3(%arg0: i32) -> (i32, i32) {
    %c0_i32 = arith.constant 0 : i32
    %c0_i32_0 = arith.constant 0 : i32
    %c0_i32_1 = arith.constant 0 : i32
    return %c0_i32, %c0_i32_0 : i32, i32
  }
  func.func @transform_4(%arg0: i32) -> (i32, i32) {
    %c0_i32 = arith.constant 0 : i32
    %c0_i32_0 = arith.constant 0 : i32
    %c0_i32_1 = arith.constant 0 : i32
    return %c0_i32, %c0_i32_0 : i32, i32
  }
  func.func @transform_5(%arg0: i32) -> (i32, i32) {
    %c0_i32 = arith.constant 0 : i32
    %c0_i32_0 = arith.constant 0 : i32
    %c0_i32_1 = arith.constant 0 : i32
    return %c0_i32, %c0_i32_0 : i32, i32
  }
  func.func @transform_6(%arg0: i32) -> (i32, i32) {
    %c0_i32 = arith.constant 0 : i32
    %c0_i32_0 = arith.constant 0 : i32
    %c0_i32_1 = arith.constant 0 : i32
    return %c0_i32, %c0_i32_0 : i32, i32
  }
  func.func @transform_7(%arg0: i32) -> (i32, i32) {
    %c0_i32 = arith.constant 0 : i32
    %c0_i32_0 = arith.constant 0 : i32
    %c0_i32_1 = arith.constant 0 : i32
    return %c0_i32, %c0_i32_0 : i32, i32
  }
  func.func @transform_8(%arg0: i32) -> (i32, i32) {
    %c0_i32 = arith.constant 0 : i32
    %c0_i32_0 = arith.constant 0 : i32
    %c0_i32_1 = arith.constant 0 : i32
    return %c0_i32, %c0_i32_0 : i32, i32
  }
  func.func @transform_9(%arg0: i32) -> (i32, i32) {
    %c0_i32 = arith.constant 0 : i32
    %c0_i32_0 = arith.constant 0 : i32
    %c0_i32_1 = arith.constant 0 : i32
    return %c0_i32, %c0_i32_0 : i32, i32
  }
  func.func @transform_10(%arg0: i32) -> (i32, i32) {
    %c0_i32 = arith.constant 0 : i32
    %c0_i32_0 = arith.constant 0 : i32
    %c0_i32_1 = arith.constant 0 : i32
    return %c0_i32, %c0_i32_0 : i32, i32
  }
  func.func @transform_11(%arg0: i32) -> (i32, i32) {
    %c0_i32 = arith.constant 0 : i32
    %c0_i32_0 = arith.constant 0 : i32
    %c0_i32_1 = arith.constant 0 : i32
    return %c0_i32, %c0_i32_0 : i32, i32
  }
  func.func @transform_12(%arg0: i32) -> (i32, i32) {
    %c0_i32 = arith.constant 0 : i32
    %c0_i32_0 = arith.constant 0 : i32
    %c0_i32_1 = arith.constant 0 : i32
    return %c0_i32, %c0_i32_0 : i32, i32
  }
}

</mosaic_0001>

<bundles_post_ra>
// kernel: vae_forward.2
= control target key start
LH: loop header
LB: loop body
LE: loop exit
PB: predicated region body
PF: predicated region fallthrough
CT: control target
= control target key end

     0   :  { %v1471_v2 = vmov 0.0   ;;  %vm49_vm0 = vcmask 130048   ;;  %s1777_s0 = inlined_call_operand.vmem [shape: f32[16,16], index: 0, kind: input, shape index: {}]   ;;  %s1778_s1 = inlined_call_operand.vmem [shape: f32[2,16], index: 1, kind: input, shape index: {}]   ;;  %s1779_s2 = inlined_call_operand.vmem [shape: f32[16,96], index: 2, kind: input, shape index: {}]   ;;  %s1780_s3 = inlined_call_operand.vmem [shape: f32[32,96], index: 3, kind: input, shape index: {}]   ;;  %s1781_s4 = inlined_call_operand.vmem [shape: f32[1,96], index: 4, kind: input, shape index: {}]   ;;  %s1782_s5 = inlined_call_operand.vmem [shape: f32[1,96], index: 5, kind: input, shape index: {}]   ;;  %s1783_s6 = inlined_call_operand.vmem [shape: f32[32,16], index: 6, kind: input, shape index: {}]   ;;  %s1784_s7 = inlined_call_operand.vmem [shape: f32[1,16], index: 7, kind: input, shape index: {}]   ;;  %s1785_s8 = inlined_call_operand.vmem [shape: f32[32,16], index: 8, kind: input, shape index: {}]   ;;  %s1786_s9 = inlined_call_operand.vmem [shape: f32[1,16], index: 9, kind: input, shape index: {}]   ;;  %s1787_s10 = inlined_call_operand.vmem [shape: f32[2,16], index: 10, kind: output, shape index: {0}]   ;;  %s1788_s11 = inlined_call_operand.hbm [shape: f32[1,1], index: 11, kind: output, shape index: {1}]  }
   0x1   :  { %v1539_v0 = vld [vmem:[%s1780_s3 + $0x18] sm:$0xff]  ;;  %v41_v1 = vld [vmem:[%s1779_s2 + $0x8] sm:$0xff]  ;;  %1280 = vmatprep.subr.mxu1 %v1471_v2  ;;  %v1548_v3 = vld [vmem:[%s1780_s3 + $0x10] sm:$0xff] }
   0x2   :  { %1273 = vmatprep.subr.mxu0 %v41_v1  ;;  %v40_v4 = vld [vmem:[%s1779_s2] sm:$0xff]  ;;  %1281 = vmatpush3.msra.mxu1 %v1539_v0 }
   0x3   :  { %1274 = vmatpush3.msra.mxu0 %v41_v1  ;;  %v38_v5 = vld [vmem:[%s1777_s0] sm:$0xff] }
   0x4   :  { %17 = vsyncpa [#allocation3], 0  ;;  %1282 = vmatprep.subr.mxu1 %v1471_v2  ;;  %1275 = vmatprep.subr.mxu0 %v40_v4  ;;  %v1561_v6 = vld [vmem:[%s1780_s3 + $0x8] sm:$0xff]  ;;  %v1571_v8 = vld [vmem:[%s1780_s3] sm:$0xff]  ;;  %vm1472_vm1 = vmmov 0   ;;  %s1473_s15 = smov 64  }
   0x5   :  { %v39_v7 = vld [vmem:[%s1777_s0 + $0x8] sm:$0xff]  ;;  %1283 = vmatpush3.msra.mxu1 %v1548_v3  ;;  %1276 = vmatpush3.msra.mxu0 %v40_v4  ;;  %v1195_v10 = vld [vmem:[%s1781_s4] ss:$0 sm:$0xff]  ;;  %s1474_s4 = smov 96   ;;  %vm142_vm2 = vcmask 261120   ;;  %vm1153_vm3 = vcmask 123904  }
   0x6   :  { %1284 = vmatprep.subr.mxu1 %v1471_v2  ;;  %1277 = vmatprep.mubr.msk.f32.mxu0 %vm49_vm0, %v38_v5  ;;  %v1609_v12 = vld [vmem:[%s1782_s5] ss:$0 sm:$0xff]  ;;  %vm1175_vm4 = vcmask 0  }
   0x7   :  { %1285 = vmatpush3.msra.mxu1 %v1561_v6  ;;  %1278 = vmatmul.mubr.msk.f32.vlgmr.msra.gmra.mxu0 %vm49_vm0, %v39_v7 }
   0x8   :  { %1286 = vmatprep.subr.mxu1 %v1471_v2  ;;  %1288 = vmatprep.mubr.msk.f32.mxu1 %vm1472_vm1, %v1471_v2 }
   0x9   :  { %1287 = vmatpush3.msra.mxu1 %v1571_v8  ;;  %1291 = vmatprep.subr.mxu0 %v1471_v2 }
   0xa   :  { %1289 = vmatmul.mubr.f32.vlgmr.msra.gmra.mxu1 %v1471_v2  ;;  %1292 = vmatpush3.msra.mxu0 %v1539_v0 }
   0xb   :  { %1293 = vmatprep.subr.mxu0 %v1471_v2  ;;  %1299 = vmatprep.mubr.msk.f32.mxu0 %vm1472_vm1, %v1471_v2 }
   0xc   :  { %1294 = vmatpush3.msra.mxu0 %v1548_v3  ;;  %1302 = vmatprep.subr.mxu1 %v1471_v2 }
   0xd   :  { %1295 = vmatprep.subr.mxu0 %v1471_v2  ;;  %1303 = vmatpush3.msra.mxu1 %v1539_v0 }
   0xe   :  { %1296 = vmatpush3.msra.mxu0 %v1561_v6  ;;  %1304 = vmatprep.subr.mxu1 %v1471_v2 }
   0xf   :  { %1297 = vmatprep.subr.mxu0 %v1471_v2  ;;  %1305 = vmatpush3.msra.mxu1 %v1548_v3 }
  0x10   :  { %1298 = vmatpush3.msra.mxu0 %v1571_v8  ;;  %1306 = vmatprep.subr.mxu1 %v1471_v2 }
  0x11   :  { %1307 = vmatpush3.msra.mxu1 %v1561_v6  ;;  %1310 = vmatprep.mubr.msk.f32.mxu1 %vm1472_vm1, %v1471_v2 }
  0x12   :  { %1308 = vmatprep.subr.mxu1 %v1471_v2  ;;  %1313 = vmatprep.subr.mxu0 %v1471_v2 }
  0x13   :  { %1309 = vmatpush3.msra.mxu1 %v1571_v8 }
  0x14   :  { %1324 = vmatprep.subr.mxu1 %v1471_v2 }
  0xc7   :  { %v1279_v9 = vpop.f32.mrf.mxu0 }
  0xc8   :  { %v1604_v11 = vadd.f32 %v1279_v9, %v1195_v10 }
  0xc9   :  { %v122_v16 = vpop.f32.mrf.mxu0 }
  0xca   :  { %v212_v13 = vpop.f32.mrf.mxu1  ;;  %v1613_v17 = vadd.f32 %v1195_v10, %v122_v16 }
  0xcb   :  { %v213_v14 = vadd.f32 %v1609_v12, %v212_v13 }
  0xcc   :  { %v1290_v15 = vpop.f32.mrf.mxu1 }
  0xcd   :  { %224 = vrot.lane.b32.xlu0 %v213_v14, %s1473_s15  ;;  %v216_v18 = vadd.f32 %v213_v14, %v1613_v17 }
  0xcf   :  { %v1199_v19 = vmul.f32 -1.442695, %v216_v18 }
  0xd1   :  { %1397 = vpow2.f32 %v1199_v19 }
  0xde   :  { %v1398_v20 = vpop.eup %1397 }
  0xdf   :  { %v220_v21 = vadd.f32 1.0, %v1398_v20 }
  0xe1   :  { %1399 = vrcp.f32 %v220_v21 }
  0xee   :  { %v1400_v22 = vpop.eup %1399 }
  0xef   :  { %v234_v28 = vsub.f32 1.0, %v1400_v22  ;;  %v240_v30 = vmul.f32 0.0, %v1400_v22 }
 0x13f   :  { %v225_v23 = vpop.permute.xlu0 %224 }
 0x140   :  { %v227_v24 = vmul.f32 %v1400_v22, %v225_v23 }
 0x142   :  { %229 = vrot.lane.b32.xlu0 %v227_v24, %s1473_s15 }
 0x1b4   :  { %v230_v25 = vpop.permute.xlu0 %229 }
 0x1b5   :  { %v232_v26 = vadd.f32 %v230_v25, %v1613_v17 }
 0x1b7   :  { %1401 = vtanh.f32 %v232_v26 }
 0x1c4   :  { %v1402_v27 = vpop.eup %1401 }
 0x1c5   :  { %236 = vrot.lane.b32.xlu1 %v1402_v27, %s1474_s4 }
 0x237   :  { %v237_v29 = vpop.permute.xlu1 %236 }
 0x238   :  { %v239_v31 = vmul.f32 %v237_v29, %v234_v28 }
 0x23a   :  { %v241_v32 = vadd.f32 %v240_v30, %v239_v31 }
 0x23c   :  { %243 = vrot.lane.b32.xlu1 %v241_v32, %s1474_s4  ;;  %v343_v48 = vrot.slane %v241_v32, 6 }
 0x2ae   :  { %v244_v33 = vpop.permute.xlu1 %243 }
 0x2af   :  { %1300 = vmatmul.mubr.msk.f32.vlgmr.msra.gmra.mxu0 %vm142_vm2, %v244_v33 }
 0x2b0   :  { %1314 = vmatpush3.msra.mxu0 %v1539_v0  ;;  %1321 = vmatprep.mubr.msk.f32.mxu0 %vm1472_vm1, %v1471_v2 }
 0x2b1   :  { %1315 = vmatprep.subr.mxu0 %v1471_v2 }
 0x2b2   :  { %1316 = vmatpush3.msra.mxu0 %v1548_v3 }
 0x2b3   :  { %1317 = vmatprep.subr.mxu0 %v1471_v2 }
 0x2b4   :  { %1318 = vmatpush3.msra.mxu0 %v1561_v6 }
 0x2b5   :  { %1319 = vmatprep.subr.mxu0 %v1471_v2 }
 0x2b6   :  { %1320 = vmatpush3.msra.mxu0 %v1571_v8 }
 0x2b7   :  { %1335 = vmatprep.subr.mxu0 %v1471_v2 }
 0x36f   :  { %v313_v34 = vpop.f32.mrf.mxu0 }
 0x370   :  { %v314_v35 = vadd.f32 %v1609_v12, %v313_v34 }
 0x371   :  { %v1301_v36 = vpop.f32.mrf.mxu0 }
 0x372   :  { %v318_v37 = vrot.slane %v314_v35, 6 }
 0x374   :  { %327 = vrot.lane.b32.xlu0 %v318_v37, %s1473_s15  ;;  %v320_v38 = vadd.f32 %v318_v37, %v1613_v17 }
 0x376   :  { %v1201_v39 = vmul.f32 -1.442695, %v320_v38 }
 0x378   :  { %1403 = vpow2.f32 %v1201_v39 }
 0x385   :  { %v1404_v40 = vpop.eup %1403 }
 0x386   :  { %v324_v41 = vadd.f32 1.0, %v1404_v40 }
 0x388   :  { %1405 = vrcp.f32 %v324_v41 }
 0x395   :  { %v1406_v42 = vpop.eup %1405 }
 0x396   :  { %v337_v49 = vsub.f32 1.0, %v1406_v42  ;;  %v345_v52 = vmul.f32 %v1406_v42, %v343_v48 }
 0x3e6   :  { %v328_v43 = vpop.permute.xlu0 %327 }
 0x3e7   :  { %v330_v44 = vmul.f32 %v1406_v42, %v328_v43 }
 0x3e9   :  { %332 = vrot.lane.b32.xlu1 %v330_v44, %s1473_s15 }
 0x45b   :  { %v333_v45 = vpop.permute.xlu1 %332 }
 0x45c   :  { %v335_v46 = vadd.f32 %v333_v45, %v1613_v17 }
 0x45e   :  { %1407 = vtanh.f32 %v335_v46 }
 0x46b   :  { %v1408_v47 = vpop.eup %1407 }
 0x46c   :  { %339 = vrot.lane.b32.xlu0 %v1408_v47, %s1474_s4 }
 0x4de   :  { %v340_v50 = vpop.permute.xlu0 %339 }
 0x4df   :  { %v342_v51 = vmul.f32 %v340_v50, %v337_v49 }
 0x4e1   :  { %v346_v53 = vadd.f32 %v345_v52, %v342_v51 }
 0x4e3   :  { %v348_v54 = vrot.slane %v346_v53, 2  ;;  %v449_v13 = vrot.slane %v346_v53, 6 }
 0x4e5   :  { %349 = vrot.lane.b32.xlu1 %v348_v54, %s1474_s4 }
 0x557   :  { %v350_v55 = vpop.permute.xlu1 %349 }
 0x558   :  { %1311 = vmatmul.mubr.msk.f32.vlgmr.msra.gmra.mxu1 %vm142_vm2, %v350_v55 }
 0x559   :  { %1325 = vmatpush3.msra.mxu1 %v1539_v0  ;;  %1332 = vmatprep.mubr.msk.f32.mxu1 %vm1472_vm1, %v1471_v2 }
 0x55a   :  { %1326 = vmatprep.subr.mxu1 %v1471_v2 }
 0x55b   :  { %1327 = vmatpush3.msra.mxu1 %v1548_v3 }
 0x55c   :  { %1328 = vmatprep.subr.mxu1 %v1471_v2 }
 0x55d   :  { %1329 = vmatpush3.msra.mxu1 %v1561_v6 }
 0x55e   :  { %1330 = vmatprep.subr.mxu1 %v1471_v2 }
 0x55f   :  { %1331 = vmatpush3.msra.mxu1 %v1571_v8 }
 0x560   :  { %1346 = vmatprep.subr.mxu1 %v1471_v2 }
 0x618   :  { %v419_v56 = vpop.f32.mrf.mxu1 }
 0x619   :  { %v420_v57 = vadd.f32 %v1609_v12, %v419_v56 }
 0x61a   :  { %v1312_v58 = vpop.f32.mrf.mxu1 }
 0x61b   :  { %v424_v59 = vrot.slane %v420_v57, 4 }
 0x61d   :  { %433 = vrot.lane.b32.xlu0 %v424_v59, %s1473_s15  ;;  %v426_v60 = vadd.f32 %v424_v59, %v1613_v17 }
 0x61f   :  { %v1203_v61 = vmul.f32 -1.442695, %v426_v60 }
 0x621   :  { %1409 = vpow2.f32 %v1203_v61 }
 0x62e   :  { %v1410_v62 = vpop.eup %1409 }
 0x62f   :  { %v430_v63 = vadd.f32 1.0, %v1410_v62 }
 0x631   :  { %1411 = vrcp.f32 %v430_v63 }
 0x63e   :  { %v1412_v1 = vpop.eup %1411 }
 0x63f   :  { %v443_v14 = vsub.f32 1.0, %v1412_v1  ;;  %v451_v16 = vmul.f32 %v1412_v1, %v449_v13 }
 0x68f   :  { %v434_v4 = vpop.permute.xlu0 %433 }
 0x690   :  { %v436_v5 = vmul.f32 %v1412_v1, %v434_v4 }
 0x692   :  { %438 = vrot.lane.b32.xlu1 %v436_v5, %s1473_s15 }
 0x704   :  { %v439_v7 = vpop.permute.xlu1 %438 }
 0x705   :  { %v441_v9 = vadd.f32 %v439_v7, %v1613_v17 }
 0x707   :  { %1413 = vtanh.f32 %v441_v9 }
 0x714   :  { %v1414_v10 = vpop.eup %1413 }
 0x715   :  { %445 = vrot.lane.b32.xlu0 %v1414_v10, %s1474_s4 }
 0x787   :  { %v446_v15 = vpop.permute.xlu0 %445 }
 0x788   :  { %v448_v18 = vmul.f32 %v446_v15, %v443_v14 }
 0x78a   :  { %v452_v19 = vadd.f32 %v451_v16, %v448_v18 }
 0x78c   :  { %v454_v20 = vrot.slane %v452_v19, 4  ;;  %v555_v36 = vrot.slane %v452_v19, 6 }
 0x78e   :  { %455 = vrot.lane.b32.xlu1 %v454_v20, %s1474_s4 }
 0x800   :  { %v456_v21 = vpop.permute.xlu1 %455 }
 0x801   :  { %1322 = vmatmul.mubr.msk.f32.vlgmr.msra.gmra.mxu0 %vm142_vm2, %v456_v21 }
 0x802   :  { %1336 = vmatpush3.msra.mxu0 %v1539_v0  ;;  %1343 = vmatprep.mubr.msk.f32.mxu0 %vm1472_vm1, %v1471_v2 }
 0x803   :  { %1337 = vmatprep.subr.mxu0 %v1471_v2 }
 0x804   :  { %1338 = vmatpush3.msra.mxu0 %v1548_v3 }
 0x805   :  { %1339 = vmatprep.subr.mxu0 %v1471_v2 }
 0x806   :  { %1340 = vmatpush3.msra.mxu0 %v1561_v6 }
 0x807   :  { %1341 = vmatprep.subr.mxu0 %v1471_v2 }
 0x808   :  { %1342 = vmatpush3.msra.mxu0 %v1571_v8 }
 0x809   :  { %1357 = vmatprep.subr.mxu0 %v1471_v2 }
 0x8c1   :  { %v525_v22 = vpop.f32.mrf.mxu0 }
 0x8c2   :  { %v526_v23 = vadd.f32 %v1609_v12, %v525_v22 }
 0x8c3   :  { %v1323_v24 = vpop.f32.mrf.mxu0 }
 0x8c4   :  { %v530_v25 = vrot.slane %v526_v23, 2 }
 0x8c6   :  { %539 = vrot.lane.b32.xlu0 %v530_v25, %s1473_s15  ;;  %v532_v26 = vadd.f32 %v530_v25, %v1613_v17 }
 0x8c8   :  { %v1205_v27 = vmul.f32 -1.442695, %v532_v26 }
 0x8ca   :  { %1415 = vpow2.f32 %v1205_v27 }
 0x8d7   :  { %v1416_v28 = vpop.eup %1415 }
 0x8d8   :  { %v536_v29 = vadd.f32 1.0, %v1416_v28 }
 0x8da   :  { %1417 = vrcp.f32 %v536_v29 }
 0x8e7   :  { %v1418_v30 = vpop.eup %1417 }
 0x8e8   :  { %v549_v37 = vsub.f32 1.0, %v1418_v30  ;;  %v557_v39 = vmul.f32 %v1418_v30, %v555_v36 }
 0x938   :  { %v540_v31 = vpop.permute.xlu0 %539 }
 0x939   :  { %v542_v32 = vmul.f32 %v1418_v30, %v540_v31 }
 0x93b   :  { %544 = vrot.lane.b32.xlu1 %v542_v32, %s1473_s15 }
 0x9ad   :  { %v545_v33 = vpop.permute.xlu1 %544 }
 0x9ae   :  { %v547_v34 = vadd.f32 %v545_v33, %v1613_v17 }
 0x9b0   :  { %1419 = vtanh.f32 %v547_v34 }
 0x9bd   :  { %v1420_v35 = vpop.eup %1419 }
 0x9be   :  { %551 = vrot.lane.b32.xlu0 %v1420_v35, %s1474_s4 }
 0xa30   :  { %v552_v38 = vpop.permute.xlu0 %551 }
 0xa31   :  { %v554_v40 = vmul.f32 %v552_v38, %v549_v37 }
 0xa33   :  { %v558_v41 = vadd.f32 %v557_v39, %v554_v40 }
 0xa35   :  { %v560_v42 = vrot.slane %v558_v41, 6 }
 0xa37   :  { %561 = vrot.lane.b32.xlu1 %v560_v42, %s1474_s4 }
 0xaa9   :  { %v562_v43 = vpop.permute.xlu1 %561 }
 0xaaa   :  { %1333 = vmatmul.mubr.msk.f32.vlgmr.msra.gmra.mxu1 %vm142_vm2, %v562_v43 }
 0xaab   :  { %1347 = vmatpush3.msra.mxu1 %v1539_v0  ;;  %1354 = vmatprep.mubr.msk.f32.mxu1 %vm1472_vm1, %v1471_v2 }
 0xaac   :  { %1348 = vmatprep.subr.mxu1 %v1471_v2 }
 0xaad   :  { %1349 = vmatpush3.msra.mxu1 %v1548_v3 }
 0xaae   :  { %1350 = vmatprep.subr.mxu1 %v1471_v2 }
 0xaaf   :  { %1351 = vmatpush3.msra.mxu1 %v1561_v6 }
 0xab0   :  { %1352 = vmatprep.subr.mxu1 %v1471_v2 }
 0xab1   :  { %1353 = vmatpush3.msra.mxu1 %v1571_v8 }
 0xab2   :  { %1368 = vmatprep.subr.mxu1 %v1471_v2 }
 0xb6a   :  { %v631_v17 = vpop.f32.mrf.mxu1 }
 0xb6b   :  { %v632_v44 = vadd.f32 %v1609_v12, %v631_v17 }
 0xb6c   :  { %v1334_v45 = vpop.f32.mrf.mxu1 }
 0xb6d   :  { %643 = vrot.lane.b32.xlu0 %v632_v44, %s1473_s15  ;;  %v635_v46 = vadd.f32 %v632_v44, %v1604_v11 }
 0xb6f   :  { %v1207_v47 = vmul.f32 -1.442695, %v635_v46 }
 0xb71   :  { %1421 = vpow2.f32 %v1207_v47 }
 0xb7e   :  { %v1422_v48 = vpop.eup %1421 }
 0xb7f   :  { %v639_v49 = vadd.f32 1.0, %v1422_v48 }
 0xb81   :  { %1423 = vrcp.f32 %v639_v49 }
 0xb8e   :  { %v1424_v50 = vpop.eup %1423 }
 0xb8f   :  { %v653_v56 = vsub.f32 1.0, %v1424_v50  ;;  %v660_v58 = vmul.f32 %v1424_v50, %v560_v42 }
 0xbdf   :  { %v644_v51 = vpop.permute.xlu0 %643 }
 0xbe0   :  { %v646_v52 = vmul.f32 %v1424_v50, %v644_v51 }
 0xbe2   :  { %648 = vrot.lane.b32.xlu1 %v646_v52, %s1473_s15 }
 0xc54   :  { %v649_v53 = vpop.permute.xlu1 %648 }
 0xc55   :  { %v651_v54 = vadd.f32 %v649_v53, %v1604_v11 }
 0xc57   :  { %1425 = vtanh.f32 %v651_v54 }
 0xc64   :  { %v1426_v55 = vpop.eup %1425 }
 0xc65   :  { %655 = vrot.lane.b32.xlu0 %v1426_v55, %s1474_s4 }
 0xcd7   :  { %v656_v57 = vpop.permute.xlu0 %655 }
 0xcd8   :  { %v658_v59 = vmul.f32 %v656_v57, %v653_v56 }
 0xcda   :  { %v661_v60 = vadd.f32 %v660_v58, %v658_v59  ;;  %v1069_v58 = vld [vmem:[%s1785_s8 + $0x18] sm:$0xff]  ;;  %v981_v59 = vld [vmem:[%s1783_s6 + $0x10] sm:$0xff] }
 0xcdc   :  { %663 = vrot.lane.b32.xlu1 %v661_v60, %s1474_s4  ;;  %v763_v15 = vrot.slane %v661_v60, 6  ;;  %v1068_v60 = vld [vmem:[%s1785_s8 + $0x10] sm:$0xff] }
 0xd4e   :  { %v664_v61 = vpop.permute.xlu1 %663 }
 0xd4f   :  { %1344 = vmatmul.mubr.msk.f32.vlgmr.msra.gmra.mxu0 %vm142_vm2, %v664_v61  ;;  %v1067_v61 = vld [vmem:[%s1785_s8 + $0x8] sm:$0xff] }
 0xd50   :  { %1358 = vmatpush3.msra.mxu0 %v1539_v0  ;;  %1365 = vmatprep.mubr.msk.f32.mxu0 %vm1472_vm1, %v1471_v2 }
 0xd51   :  { %1359 = vmatprep.subr.mxu0 %v1471_v2 }
 0xd52   :  { %1360 = vmatpush3.msra.mxu0 %v1548_v3 }
 0xd53   :  { %1361 = vmatprep.subr.mxu0 %v1471_v2 }
 0xd54   :  { %1362 = vmatpush3.msra.mxu0 %v1561_v6 }
 0xd55   :  { %1363 = vmatprep.subr.mxu0 %v1471_v2 }
 0xd56   :  { %1364 = vmatpush3.msra.mxu0 %v1571_v8 }
 0xd57   :  { %1379 = vmatprep.subr.mxu0 %v1471_v2 }
 0xe0f   :  { %v733_v62 = vpop.f32.mrf.mxu0 }
 0xe10   :  { %v734_v0 = vadd.f32 %v1609_v12, %v733_v62  ;;  %v979_v62 = vld [vmem:[%s1783_s6] sm:$0xff] }
 0xe11   :  { %v1345_v63 = vpop.f32.mrf.mxu0 }
 0xe12   :  { %v738_v1 = vrot.slane %v734_v0, 6  ;;  %v1066_v0 = vld [vmem:[%s1785_s8] sm:$0xff] }
 0xe14   :  { %747 = vrot.lane.b32.xlu0 %v738_v1, %s1473_s15  ;;  %v740_v4 = vadd.f32 %v738_v1, %v1604_v11 }
 0xe16   :  { %v1209_v3 = vmul.f32 -1.442695, %v740_v4 }
 0xe18   :  { %1427 = vpow2.f32 %v1209_v3 }
 0xe25   :  { %v1428_v5 = vpop.eup %1427 }
 0xe26   :  { %v744_v7 = vadd.f32 1.0, %v1428_v5 }
 0xe28   :  { %1429 = vrcp.f32 %v744_v7 }
 0xe35   :  { %v1430_v6 = vpop.eup %1429 }
 0xe36   :  { %v757_v16 = vsub.f32 1.0, %v1430_v6  ;;  %v765_v20 = vmul.f32 %v1430_v6, %v763_v15 }
 0xe86   :  { %v748_v9 = vpop.permute.xlu0 %747 }
 0xe87   :  { %v750_v10 = vmul.f32 %v1430_v6, %v748_v9 }
 0xe89   :  { %752 = vrot.lane.b32.xlu1 %v750_v10, %s1473_s15 }
 0xefb   :  { %v753_v8 = vpop.permute.xlu1 %752 }
 0xefc   :  { %v755_v13 = vadd.f32 %v753_v8, %v1604_v11 }
 0xefe   :  { %1431 = vtanh.f32 %v755_v13 }
 0xf0b   :  { %v1432_v14 = vpop.eup %1431 }
 0xf0c   :  { %759 = vrot.lane.b32.xlu0 %v1432_v14, %s1474_s4 }
 0xf7e   :  { %v760_v18 = vpop.permute.xlu0 %759 }
 0xf7f   :  { %v762_v19 = vmul.f32 %v760_v18, %v757_v16 }
 0xf81   :  { %v766_v21 = vadd.f32 %v765_v20, %v762_v19 }
 0xf83   :  { %v768_v22 = vrot.slane %v766_v21, 2  ;;  %v869_v38 = vrot.slane %v766_v21, 6  ;;  %v1214_v21 = vld [vmem:[%s1784_s7] ss:$0 sm:$0xff]  ;;  %s1475_s7 = smov [#allocation2]  }
 0xf84   :  { %s1185_s14 = sshll.u32 %s1475_s7, 4  ;;  %s1186_s14 = int_to_ptr.vmem [resolvable:$true] %s1185_s14 }
 0xf85   :  { %769 = vrot.lane.b32.xlu1 %v768_v22, %s1474_s4  ;;  %p1454_p1 = scmp.lt.s32.totalorder %s1186_s14, %s1186_s14 }
 0xff7   :  { %v770_v23 = vpop.permute.xlu1 %769 }
 0xff8   :  { %1355 = vmatmul.mubr.msk.f32.vlgmr.msra.gmra.mxu1 %vm142_vm2, %v770_v23 }
 0xff9   :  { %1376 = vmatprep.mubr.msk.f32.mxu1 %vm1472_vm1, %v1471_v2 }
0x10b8   :  { %v839_v24 = vpop.f32.mrf.mxu1 }
0x10b9   :  { %v840_v25 = vadd.f32 %v1609_v12, %v839_v24 }
0x10ba   :  { %v1356_v26 = vpop.f32.mrf.mxu1 }
0x10bb   :  { %v844_v27 = vrot.slane %v840_v25, 4  ;;  %v1150_v25 = vld [vmem:[%s1778_s1] sm:$0x3] }
0x10bd   :  { %853 = vrot.lane.b32.xlu0 %v844_v27, %s1473_s15  ;;  %v846_v28 = vadd.f32 %v844_v27, %v1604_v11 }
0x10bf   :  { %v1211_v29 = vmul.f32 -1.442695, %v846_v28 }
0x10c1   :  { %1433 = vpow2.f32 %v1211_v29 }
0x10ce   :  { %v1434_v30 = vpop.eup %1433 }
0x10cf   :  { %v850_v31 = vadd.f32 1.0, %v1434_v30 }
0x10d1   :  { %1435 = vrcp.f32 %v850_v31 }
0x10de   :  { %v1436_v32 = vpop.eup %1435 }
0x10df   :  { %v863_v39 = vsub.f32 1.0, %v1436_v32  ;;  %v871_v41 = vmul.f32 %v1436_v32, %v869_v38 }
0x112f   :  { %v854_v33 = vpop.permute.xlu0 %853 }
0x1130   :  { %v856_v34 = vmul.f32 %v1436_v32, %v854_v33 }
0x1132   :  { %858 = vrot.lane.b32.xlu1 %v856_v34, %s1473_s15 }
0x11a4   :  { %v859_v35 = vpop.permute.xlu1 %858 }
0x11a5   :  { %v861_v36 = vadd.f32 %v859_v35, %v1604_v11 }
0x11a7   :  { %1437 = vtanh.f32 %v861_v36 }
0x11b4   :  { %v1438_v37 = vpop.eup %1437 }
0x11b5   :  { %865 = vrot.lane.b32.xlu0 %v1438_v37, %s1474_s4 }
0x1227   :  { %v866_v40 = vpop.permute.xlu0 %865 }
0x1228   :  { %v868_v42 = vmul.f32 %v866_v40, %v863_v39 }
0x122a   :  { %v872_v43 = vadd.f32 %v871_v41, %v868_v42 }
0x122c   :  { %v874_v17 = vrot.slane %v872_v43, 4  ;;  %v975_v1 = vrot.slane %v872_v43, 6 }
0x122e   :  { %875 = vrot.lane.b32.xlu1 %v874_v17, %s1474_s4 }
0x12a0   :  { %v876_v44 = vpop.permute.xlu1 %875 }
0x12a1   :  { %1366 = vmatmul.mubr.msk.f32.vlgmr.msra.gmra.mxu0 %vm142_vm2, %v876_v44 }
0x12a2   :  { %1387 = vmatprep.mubr.msk.f32.mxu0 %vm1472_vm1, %v1471_v2  ;;  %1380 = vmatpush3.msra.mxu0 %v1069_v58 }
0x12a3   :  { %1381 = vmatprep.subr.mxu0 %v1471_v2 }
0x12a4   :  { %1382 = vmatpush3.msra.mxu0 %v1068_v60 }
0x12a5   :  { %1383 = vmatprep.subr.mxu0 %v1471_v2 }
0x12a6   :  { %1384 = vmatpush3.msra.mxu0 %v1067_v61 }
0x12a7   :  { %1385 = vmatprep.subr.mxu0 %v1471_v2 }
0x12a8   :  { %1386 = vmatpush3.msra.mxu0 %v1066_v0 }
0x1361   :  { %v945_v45 = vpop.f32.mrf.mxu0 }
0x1362   :  { %v946_v46 = vadd.f32 %v1609_v12, %v945_v45  ;;  %v982_v12 = vld [vmem:[%s1783_s6 + $0x18] sm:$0xff] }
0x1363   :  { %v1367_v47 = vpop.f32.mrf.mxu0  ;;  %1369 = vmatpush3.msra.mxu1 %v982_v12 }
0x1364   :  { %v950_v48 = vrot.slane %v946_v46, 2  ;;  %1370 = vmatprep.subr.mxu1 %v1471_v2 }
0x1365   :  { %1371 = vmatpush3.msra.mxu1 %v981_v59 }
0x1366   :  { %959 = vrot.lane.b32.xlu0 %v950_v48, %s1473_s15  ;;  %v952_v49 = vadd.f32 %v950_v48, %v1604_v11  ;;  %1372 = vmatprep.subr.mxu1 %v1471_v2 }
0x1368   :  { %v1213_v50 = vmul.f32 -1.442695, %v952_v49 }
0x136a   :  { %1439 = vpow2.f32 %v1213_v50 }
0x1377   :  { %v1440_v51 = vpop.eup %1439 }
0x1378   :  { %v956_v52 = vadd.f32 1.0, %v1440_v51 }
0x137a   :  { %1441 = vrcp.f32 %v956_v52 }
0x1387   :  { %v1442_v53 = vpop.eup %1441 }
0x1388   :  { %v969_v4 = vsub.f32 1.0, %v1442_v53  ;;  %v977_v5 = vmul.f32 %v1442_v53, %v975_v1 }
0x13d8   :  { %v960_v54 = vpop.permute.xlu0 %959 }
0x13d9   :  { %v962_v55 = vmul.f32 %v1442_v53, %v960_v54 }
0x13db   :  { %964 = vrot.lane.b32.xlu1 %v962_v55, %s1473_s15  ;;  %s1449_s15 = scalar_lea.vmem %s1186_s14, 16 }
0x13dc   :  { %p1450_p0 = scmp.ne.s32.totalorder %s1186_s14, %s1449_s15 }
0x144d   :  { %v965_v56 = vpop.permute.xlu1 %964 }
0x144e   :  { %v967_v57 = vadd.f32 %v965_v56, %v1604_v11  ;;  %v980_v11 = vld [vmem:[%s1783_s6 + $0x8] sm:$0xff] }
0x144f   :  { %1373 = vmatpush3.msra.mxu1 %v980_v11 }
0x1450   :  { %1443 = vtanh.f32 %v967_v57  ;;  %1374 = vmatprep.subr.mxu1 %v1471_v2  ;;  %v1216_v2 = vld [vmem:[%s1786_s9] ss:$0 sm:$0xff] }
0x1451   :  { %1375 = vmatpush3.msra.mxu1 %v979_v62 }
0x145d   :  { %v1444_v63 = vpop.eup %1443 }
0x145e   :  { %971 = vrot.lane.b32.xlu0 %v1444_v63, %s1474_s4 }
0x14d0   :  { %v972_v3 = vpop.permute.xlu0 %971 }
0x14d1   :  { %v974_v7 = vmul.f32 %v972_v3, %v969_v4 }
0x14d3   :  { %v978_v6 = vadd.f32 %v977_v5, %v974_v7 }
0x14d5   :  { %v991_v9 = vrot.slane %v978_v6, 6 }
0x14d7   :  { %992 = vrot.lane.b32.xlu1 %v991_v9, %s1474_s4 }
0x1549   :  { %v993_v10 = vpop.permute.xlu1 %992 }
0x154a   :  { %1377 = vmatmul.mubr.msk.f32.vlgmr.msra.gmra.mxu1 %vm142_vm2, %v993_v10  ;;  %1388 = vmatmul.mubr.msk.f32.vlgmr.msra.gmra.mxu0 %vm142_vm2, %v993_v10 }
0x160a   :  { %v1062_v8 = vpop.f32.mrf.mxu1  ;;  %v1143_v13 = vpop.f32.mrf.mxu0 }
0x160b   :  { %v1144_v14 = vadd.f32 %v1216_v2, %v1143_v13  ;;  %v1063_v22 = vadd.f32 %v1214_v21, %v1062_v8 }
0x160c   :  { %v1378_v15 = vpop.f32.mrf.mxu1  ;;  %v1389_v16 = vpop.f32.mrf.mxu0 }
0x160d   :  { %v1147_v18 = vmul.f32 0.5, %v1144_v14  ;;  %v1155_v19 = vmul.f32 1.442695, %v1144_v14  ;;  %v1157_v23 = vmul.f32 %v1063_v22, %v1063_v22 }
0x160f   :  { %v1148_v20 = vmul.f32 1.442695, %v1147_v18  ;;  %1445 = vpow2.f32 %v1155_v19 }
0x1611   :  { %1447 = vpow2.f32 %v1148_v20 }
0x161c   :  { %v1446_v24 = vpop.eup %1445 }
0x161d   :  { %v1158_v26 = vadd.f32 %v1446_v24, %v1157_v23 }
0x161e   :  { %v1448_v27 = vpop.eup %1447 }
0x161f   :  { %v1151_v28 = vmul.f32 %v1448_v27, %v1150_v25  ;;  %v1218_v29 = vadd.f32 -1.0, %v1158_v26 }
0x1621   :  { %v1160_v30 = vsub.f32 %v1218_v29, %v1144_v14  ;;  %v1152_v31 = vadd.f32 %v1151_v28, %v1063_v22 }
0x1623   :  { %v1161_v32 = vsel %vm1153_vm3, %v1160_v30, 0.0  ;;  %1154 = vst.msk [vmem:[%s1787_s10] sm:$0x3] %vm1153_vm3, %v1152_v31  ;;  %s1453_s10 = scalar_lea.vmem %s1186_s14, 32 }
0x1624   :  { %1162 = vadd.xlane.f32.xlu0 %v1161_v32  ;;  %p1455_p2 = scmp.lt.s32.totalorder %s1453_s10, %s1449_s15 }
0x1626   :  { %p1456_p3 = por %p1455_p2, %p1454_p1 }
0x1628   :  { %p1457_p4 = pnand %p1456_p3, %p1450_p0 }
0x16ad   :  { %v1163_v33 = vpop.xlane.xlu0 %1162 }
0x16ae   :  { %v1164_v34 = vrot.slane %v1163_v33, 4 }
0x16b0   :  { %v1165_v35 = vadd.f32 %v1164_v34, %v1163_v33 }
0x16b2   :  { %v1166_v36 = vrot.slane %v1165_v35, 2 }
0x16b4   :  { %v1167_v37 = vadd.f32 %v1166_v36, %v1165_v35 }
0x16b6   :  { %v1168_v38 = vrot.slane %v1167_v37, 1 }
0x16b8   :  { %v1169_v39 = vadd.f32 %v1168_v38, %v1167_v37 }
0x16ba   :  { %1390 = vpush %v1169_v39 }
0x16eb   :  { %s1391_s1 = spop %1390 }
0x16ec   :  { %v1171_v40 = vstv %s1391_s1 }
0x16ed   :  { %v1172_v41 = vmul.f32 0.5, %v1171_v40 }
0x16ef   :  { %v1174_v42 = vmul.f32 0.5, %v1172_v41 }
0x16f1   :  { %1176 = vst.msk [vmem:[#allocation2] sm:$0x1] %vm1175_vm4, %v1174_v42 }
0x16f2   :  { %1460 = shalt.err (!%p1457_p4)
}
0x16f3   :  { %1188 = dma.vmem_to_hbm [thread:$0]  %s1186_s14, 16, %s1788_s11, [#allocation3]  }
0x16f4   :  { %1469 = dma.done.wait [#allocation3], 16  }
0x16f5   :  { %1470 = vsyncadd [#allocation3], 4294967280 }
0x16f6   :  { %1194 = vsyncpa [#allocation3], 1 }

// kernel: vae_forward.3
= control target key start
LH: loop header
LB: loop body
LE: loop exit
PB: predicated region body
PF: predicated region fallthrough
CT: control target
= control target key end

     0   :  { %vm54_vm0 = vcmask 130048   ;;  %v1643_v3 = vmov 0.0   ;;  %s1998_s0 = inlined_call_operand.vmem [shape: f32[16,16], index: 0, kind: input, shape index: {}]   ;;  %s1999_s1 = inlined_call_operand.vmem [shape: f32[2,16], index: 1, kind: input, shape index: {}]   ;;  %s2000_s2 = inlined_call_operand.vmem [shape: f32[16,16], index: 2, kind: input, shape index: {}]   ;;  %s2001_s3 = inlined_call_operand.vmem [shape: f32[16,32], index: 3, kind: input, shape index: {}]   ;;  %s2002_s4 = inlined_call_operand.vmem [shape: f32[1,32], index: 4, kind: input, shape index: {}]   ;;  %s2003_s5 = inlined_call_operand.vmem [shape: f32[16,96], index: 5, kind: input, shape index: {}]   ;;  %s2004_s6 = inlined_call_operand.vmem [shape: f32[16,96], index: 6, kind: input, shape index: {}]   ;;  %s2005_s7 = inlined_call_operand.vmem [shape: f32[32,96], index: 7, kind: input, shape index: {}]   ;;  %s2006_s8 = inlined_call_operand.vmem [shape: f32[1,96], index: 8, kind: input, shape index: {}]   ;;  %s2007_s9 = inlined_call_operand.vmem [shape: f32[1,96], index: 9, kind: input, shape index: {}]   ;;  %s2008_s10 = inlined_call_operand.vmem [shape: f32[32,16], index: 10, kind: input, shape index: {}]   ;;  %s2009_s11 = inlined_call_operand.vmem [shape: f32[1,16], index: 11, kind: input, shape index: {}]   ;;  %s2010_s12 = inlined_call_operand.hbm [shape: f32[1,1], index: 12, kind: output, shape index: {}]  }
   0x1   :  { %v46_v0 = vld [vmem:[%s2003_s5 + $0x8] sm:$0xff]  ;;  %v45_v1 = vld [vmem:[%s2003_s5] sm:$0xff]  ;;  %1440 = vmatprep.subr.mxu1 %v1643_v3 }
   0x2   :  { %v137_v2 = vld [vmem:[%s2004_s6 + $0x8] sm:$0xff]  ;;  %1433 = vmatprep.subr.mxu0 %v46_v0  ;;  %v43_v4 = vld [vmem:[%s1998_s0] sm:$0xff] }
   0x3   :  { %1434 = vmatpush3.msra.mxu0 %v46_v0  ;;  %1441 = vmatpush3.msra.mxu1 %v137_v2  ;;  %v44_v5 = vld [vmem:[%s1998_s0 + $0x8] sm:$0xff]  ;;  %v136_v6 = vld [vmem:[%s2004_s6] sm:$0xff] }
   0x4   :  { %1435 = vmatprep.subr.mxu0 %v45_v1  ;;  %1437 = vmatprep.mubr.msk.f32.mxu0 %vm54_vm0, %v43_v4 }
   0x5   :  { %17 = vsyncpa [#allocation3], 0  ;;  %1436 = vmatpush3.msra.mxu0 %v45_v1  ;;  %1442 = vmatprep.subr.mxu1 %v1643_v3  ;;  %v42_v7 = vld [vmem:[%s1999_s1] sm:$0x3]  ;;  %v212_v8 = vld [vmem:[%s2001_s3 + $0x8] sm:$0xff]  ;;  %vm1644_vm1 = vmmov 0  }
   0x6   :  { %1438 = vmatmul.mubr.msk.f32.vlgmr.msra.gmra.mxu0 %vm54_vm0, %v44_v5  ;;  %1443 = vmatpush3.msra.mxu1 %v136_v6  ;;  %v211_v9 = vld [vmem:[%s2001_s3] sm:$0xff]  ;;  %v1762_v10 = vld [vmem:[%s2005_s7 + $0x18] sm:$0xff]  ;;  %v1770_v11 = vld [vmem:[%s2005_s7 + $0x10] sm:$0xff]  ;;  %vm302_vm2 = vcmask 261120   ;;  %s1645_s27 = smov 64   ;;  %s1647_s28 = smov 32  }
   0x7   :  { %1444 = vmatprep.mubr.msk.f32.mxu1 %vm1644_vm1, %v1643_v3  ;;  %1447 = vmatprep.subr.mxu0 %v1643_v3  ;;  %v1779_v12 = vld [vmem:[%s2005_s7 + $0x8] sm:$0xff]  ;;  %v1788_v13 = vld [vmem:[%s2005_s7] sm:$0xff]  ;;  %vm1156_vm3 = vcmask 1041408   ;;  %vm1158_vm4 = vcmask 1043456   ;;  %vm1160_vm5 = vcmask 1045504   ;;  %vm1305_vm6 = vcmask 7168  }
   0x8   :  { %1445 = vmatmul.mubr.msk.f32.vlgmr.msra.gmra.mxu1 %vm54_vm0, %v42_v7  ;;  %1448 = vmatpush3.msra.mxu0 %v212_v8  ;;  %v1351_v14 = vld [vmem:[%s2006_s8] ss:$0 sm:$0xff]  ;;  %s1648_s19 = smov [#allocation2]   ;;  %vm1335_vm7 = vcmask 0  }
   0x9   :  { %1449 = vmatprep.subr.mxu0 %v1643_v3  ;;  %1451 = vmatprep.mubr.msk.f32.mxu0 %vm1644_vm1, %v1643_v3  ;;  %v1355_v20 = vld [vmem:[%s2002_s4] ss:$0 sm:$0xff]  ;;  %s1343_s20 = sshll.u32 %s1648_s19, 4  ;;  %s1344_s20 = int_to_ptr.vmem [resolvable:$true] %s1343_s20 }
   0xa   :  { %1450 = vmatpush3.msra.mxu0 %v211_v9  ;;  %1454 = vmatprep.subr.mxu1 %v1643_v3  ;;  %v1829_v36 = vld [vmem:[%s2007_s9] ss:$0 sm:$0xff]  ;;  %s1646_s9 = smov 96   ;;  %s1621_s21 = scalar_lea.vmem %s1344_s20, 16 }
   0xb   :  { %1452 = vmatmul.mubr.msk.f32.vlgmr.msra.gmra.mxu0 %vm54_vm0, %v42_v7  ;;  %1462 = vmatprep.mubr.msk.f32.mxu1 %vm1644_vm1, %v1643_v3  ;;  %p1622_p0 = scmp.ne.s32.totalorder %s1344_s20, %s1621_s21  ;;  %s1625_s22 = scalar_lea.vmem %s1344_s20, 32 }
   0xc   :  { %1465 = vmatprep.subr.mxu0 %v1643_v3  ;;  %1473 = vmatprep.mubr.msk.f32.mxu0 %vm1644_vm1, %v1643_v3  ;;  %p1626_p1 = scmp.lt.s32.totalorder %s1344_s20, %s1344_s20  ;;  %p1627_p2 = scmp.lt.s32.totalorder %s1625_s22, %s1621_s21 }
   0xd   :  { %1455 = vmatpush3.msra.mxu1 %v1762_v10  ;;  %1466 = vmatpush3.msra.mxu0 %v1762_v10 }
   0xe   :  { %1456 = vmatprep.subr.mxu1 %v1643_v3  ;;  %1467 = vmatprep.subr.mxu0 %v1643_v3  ;;  %p1628_p3 = por %p1627_p2, %p1626_p1 }
   0xf   :  { %1457 = vmatpush3.msra.mxu1 %v1770_v11  ;;  %1468 = vmatpush3.msra.mxu0 %v1770_v11 }
  0x10   :  { %1458 = vmatprep.subr.mxu1 %v1643_v3  ;;  %1469 = vmatprep.subr.mxu0 %v1643_v3  ;;  %p1629_p4 = pnand %p1628_p3, %p1622_p0 }
  0x11   :  { %1459 = vmatpush3.msra.mxu1 %v1779_v12  ;;  %1470 = vmatpush3.msra.mxu0 %v1779_v12 }
  0x12   :  { %1460 = vmatprep.subr.mxu1 %v1643_v3  ;;  %1471 = vmatprep.subr.mxu0 %v1643_v3 }
  0x13   :  { %1461 = vmatpush3.msra.mxu1 %v1788_v13  ;;  %1472 = vmatpush3.msra.mxu0 %v1788_v13 }
  0x14   :  { %1476 = vmatprep.subr.mxu1 %v1643_v3  ;;  %1487 = vmatprep.subr.mxu0 %v1643_v3 }
  0xc6   :  { %v1439_v15 = vpop.f32.mrf.mxu0 }
  0xc7   :  { %v133_v16 = vadd.f32 %v1439_v15, %v1351_v14 }
  0xc8   :  { %v207_v17 = vpop.f32.mrf.mxu1  ;;  %v127_v18 = vpop.f32.mrf.mxu0 }
  0xc9   :  { %v128_v19 = vadd.f32 %v1351_v14, %v127_v18  ;;  %v406_v21 = vrot.slane %v207_v17, 6  ;;  %v514_v22 = vrot.slane %v207_v17, 4  ;;  %v623_v23 = vrot.slane %v207_v17, 2 }
  0xca   :  { %v1446_v24 = vpop.f32.mrf.mxu1  ;;  %v1801_v25 = vadd.f32 %v207_v17, %v133_v16 }
  0xcb   :  { %v286_v26 = vpop.f32.mrf.mxu0  ;;  %v295_v27 = vadd.f32 %v207_v17, %v128_v19  ;;  %v1803_v28 = vadd.f32 %v406_v21, %v128_v19  ;;  %v1805_v29 = vadd.f32 %v514_v22, %v128_v19  ;;  %v1807_v30 = vadd.f32 %v623_v23, %v128_v19 }
  0xcc   :  { %v287_v31 = vadd.f32 %v1355_v20, %v286_v26  ;;  %v1809_v32 = vadd.f32 %v406_v21, %v133_v16  ;;  %v1811_v33 = vadd.f32 %v514_v22, %v133_v16  ;;  %v1813_v34 = vadd.f32 %v623_v23, %v133_v16 }
  0xcd   :  { %v1453_v35 = vpop.f32.mrf.mxu0 }
  0xce   :  { %1463 = vmatmul.mubr.msk.f32.vlgmr.msra.gmra.mxu1 %vm302_vm2, %v287_v31 }
  0xcf   :  { %1477 = vmatpush3.msra.mxu1 %v1762_v10  ;;  %1484 = vmatprep.mubr.msk.f32.mxu1 %vm1644_vm1, %v1643_v3 }
  0xd0   :  { %1478 = vmatprep.subr.mxu1 %v1643_v3 }
  0xd1   :  { %1479 = vmatpush3.msra.mxu1 %v1770_v11 }
  0xd2   :  { %1480 = vmatprep.subr.mxu1 %v1643_v3 }
  0xd3   :  { %1481 = vmatpush3.msra.mxu1 %v1779_v12 }
  0xd4   :  { %1482 = vmatprep.subr.mxu1 %v1643_v3 }
  0xd5   :  { %1483 = vmatpush3.msra.mxu1 %v1788_v13 }
  0xd6   :  { %1498 = vmatprep.subr.mxu1 %v1643_v3 }
 0x18e   :  { %v372_v37 = vpop.f32.mrf.mxu1 }
 0x18f   :  { %v373_v38 = vadd.f32 %v1829_v36, %v372_v37 }
 0x190   :  { %v1464_v39 = vpop.f32.mrf.mxu1 }
 0x191   :  { %384 = vrot.lane.b32.xlu0 %v373_v38, %s1645_s27  ;;  %v376_v40 = vadd.f32 %v373_v38, %v295_v27 }
 0x193   :  { %v1359_v41 = vmul.f32 -1.442695, %v376_v40 }
 0x195   :  { %1563 = vpow2.f32 %v1359_v41 }
 0x1a2   :  { %v1564_v42 = vpop.eup %1563 }
 0x1a3   :  { %v380_v43 = vadd.f32 1.0, %v1564_v42 }
 0x1a5   :  { %1565 = vrcp.f32 %v380_v43 }
 0x1b2   :  { %v1566_v44 = vpop.eup %1565 }
 0x1b3   :  { %v394_v51 = vsub.f32 1.0, %v1566_v44 }
 0x203   :  { %v385_v45 = vpop.permute.xlu0 %384 }
 0x204   :  { %v387_v46 = vmul.f32 %v1566_v44, %v385_v45 }
 0x206   :  { %389 = vrot.lane.b32.xlu0 %v387_v46, %s1645_s27 }
 0x278   :  { %v390_v47 = vpop.permute.xlu0 %389 }
 0x279   :  { %v392_v48 = vadd.f32 %v390_v47, %v295_v27 }
 0x27b   :  { %1567 = vtanh.f32 %v392_v48 }
 0x288   :  { %v1568_v49 = vpop.eup %1567 }
 0x289   :  { %396 = vrot.lane.b32.xlu1 %v1568_v49, %s1646_s9 }
 0x28d   :  { %400 = vrot.lane.b32.xlu1 %v287_v31, %s1647_s28 }
 0x2fb   :  { %v397_v50 = vpop.permute.xlu1 %396 }
 0x2fc   :  { %v399_v53 = vmul.f32 %v397_v50, %v394_v51 }
 0x2ff   :  { %v401_v52 = vpop.permute.xlu1 %400 }
 0x300   :  { %v403_v54 = vmul.f32 %v1566_v44, %v401_v52 }
 0x302   :  { %v1835_v55 = vadd.f32 %v403_v54, %v399_v53 }
 0x304   :  { %410 = vrot.lane.b32.xlu0 %v1835_v55, %s1646_s9  ;;  %v510_v9 = vrot.slane %v1835_v55, 6 }
 0x376   :  { %v411_v56 = vpop.permute.xlu0 %410 }
 0x377   :  { %1474 = vmatmul.mubr.msk.f32.vlgmr.msra.gmra.mxu0 %vm302_vm2, %v411_v56 }
 0x378   :  { %1488 = vmatpush3.msra.mxu0 %v1762_v10  ;;  %1495 = vmatprep.mubr.msk.f32.mxu0 %vm1644_vm1, %v1643_v3 }
 0x379   :  { %1489 = vmatprep.subr.mxu0 %v1643_v3 }
 0x37a   :  { %1490 = vmatpush3.msra.mxu0 %v1770_v11 }
 0x37b   :  { %1491 = vmatprep.subr.mxu0 %v1643_v3 }
 0x37c   :  { %1492 = vmatpush3.msra.mxu0 %v1779_v12 }
 0x37d   :  { %1493 = vmatprep.subr.mxu0 %v1643_v3 }
 0x37e   :  { %1494 = vmatpush3.msra.mxu0 %v1788_v13 }
 0x37f   :  { %1509 = vmatprep.subr.mxu0 %v1643_v3 }
 0x437   :  { %v480_v57 = vpop.f32.mrf.mxu0 }
 0x438   :  { %v481_v58 = vadd.f32 %v1829_v36, %v480_v57 }
 0x439   :  { %v1475_v59 = vpop.f32.mrf.mxu0 }
 0x43a   :  { %v485_v60 = vrot.slane %v481_v58, 6 }
 0x43c   :  { %494 = vrot.lane.b32.xlu1 %v485_v60, %s1645_s27  ;;  %v487_v61 = vadd.f32 %v485_v60, %v1803_v28 }
 0x43e   :  { %v1361_v62 = vmul.f32 -1.442695, %v487_v61 }
 0x440   :  { %1569 = vpow2.f32 %v1361_v62 }
 0x44d   :  { %v1570_v63 = vpop.eup %1569 }
 0x44e   :  { %v491_v0 = vadd.f32 1.0, %v1570_v63 }
 0x450   :  { %1571 = vrcp.f32 %v491_v0 }
 0x45d   :  { %v1572_v1 = vpop.eup %1571 }
 0x45e   :  { %v504_v8 = vsub.f32 1.0, %v1572_v1  ;;  %v512_v16 = vmul.f32 %v1572_v1, %v510_v9 }
 0x4ae   :  { %v495_v2 = vpop.permute.xlu1 %494 }
 0x4af   :  { %v497_v4 = vmul.f32 %v1572_v1, %v495_v2 }
 0x4b1   :  { %499 = vrot.lane.b32.xlu0 %v497_v4, %s1645_s27 }
 0x523   :  { %v500_v5 = vpop.permute.xlu0 %499 }
 0x524   :  { %v502_v6 = vadd.f32 %v500_v5, %v1803_v28 }
 0x526   :  { %1573 = vtanh.f32 %v502_v6 }
 0x533   :  { %v1574_v7 = vpop.eup %1573 }
 0x534   :  { %506 = vrot.lane.b32.xlu1 %v1574_v7, %s1646_s9 }
 0x5a6   :  { %v507_v14 = vpop.permute.xlu1 %506 }
 0x5a7   :  { %v509_v15 = vmul.f32 %v507_v14, %v504_v8 }
 0x5a9   :  { %v513_v17 = vadd.f32 %v512_v16, %v509_v15 }
 0x5ab   :  { %v518_v18 = vrot.slane %v513_v17, 2  ;;  %v619_v42 = vrot.slane %v513_v17, 6  ;;  %v1157_v47 = vsel %vm1156_vm3, %v1835_v55, %v513_v17 }
 0x5ad   :  { %519 = vrot.lane.b32.xlu0 %v518_v18, %s1646_s9 }
 0x61f   :  { %v520_v19 = vpop.permute.xlu0 %519 }
 0x620   :  { %1485 = vmatmul.mubr.msk.f32.vlgmr.msra.gmra.mxu1 %vm302_vm2, %v520_v19 }
 0x621   :  { %1499 = vmatpush3.msra.mxu1 %v1762_v10  ;;  %1506 = vmatprep.mubr.msk.f32.mxu1 %vm1644_vm1, %v1643_v3 }
 0x622   :  { %1500 = vmatprep.subr.mxu1 %v1643_v3 }
 0x623   :  { %1501 = vmatpush3.msra.mxu1 %v1770_v11 }
 0x624   :  { %1502 = vmatprep.subr.mxu1 %v1643_v3 }
 0x625   :  { %1503 = vmatpush3.msra.mxu1 %v1779_v12 }
 0x626   :  { %1504 = vmatprep.subr.mxu1 %v1643_v3 }
 0x627   :  { %1505 = vmatpush3.msra.mxu1 %v1788_v13 }
 0x628   :  { %1520 = vmatprep.subr.mxu1 %v1643_v3 }
 0x6e0   :  { %v589_v20 = vpop.f32.mrf.mxu1 }
 0x6e1   :  { %v590_v21 = vadd.f32 %v1829_v36, %v589_v20 }
 0x6e2   :  { %v1486_v22 = vpop.f32.mrf.mxu1 }
 0x6e3   :  { %v594_v23 = vrot.slane %v590_v21, 4 }
 0x6e5   :  { %603 = vrot.lane.b32.xlu1 %v594_v23, %s1645_s27  ;;  %v596_v24 = vadd.f32 %v594_v23, %v1805_v29 }
 0x6e7   :  { %v1363_v26 = vmul.f32 -1.442695, %v596_v24 }
 0x6e9   :  { %1575 = vpow2.f32 %v1363_v26 }
 0x6f6   :  { %v1576_v27 = vpop.eup %1575 }
 0x6f7   :  { %v600_v28 = vadd.f32 1.0, %v1576_v27 }
 0x6f9   :  { %1577 = vrcp.f32 %v600_v28 }
 0x706   :  { %v1578_v31 = vpop.eup %1577 }
 0x707   :  { %v613_v41 = vsub.f32 1.0, %v1578_v31  ;;  %v621_v44 = vmul.f32 %v1578_v31, %v619_v42 }
 0x757   :  { %v604_v35 = vpop.permute.xlu1 %603 }
 0x758   :  { %v606_v37 = vmul.f32 %v1578_v31, %v604_v35 }
 0x75a   :  { %608 = vrot.lane.b32.xlu0 %v606_v37, %s1645_s27 }
 0x7cc   :  { %v609_v38 = vpop.permute.xlu0 %608 }
 0x7cd   :  { %v611_v39 = vadd.f32 %v609_v38, %v1805_v29 }
 0x7cf   :  { %1579 = vtanh.f32 %v611_v39 }
 0x7dc   :  { %v1580_v40 = vpop.eup %1579 }
 0x7dd   :  { %615 = vrot.lane.b32.xlu1 %v1580_v40, %s1646_s9 }
 0x84f   :  { %v616_v43 = vpop.permute.xlu1 %615 }
 0x850   :  { %v618_v45 = vmul.f32 %v616_v43, %v613_v41 }
 0x852   :  { %v622_v46 = vadd.f32 %v621_v44, %v618_v45 }
 0x854   :  { %v627_v48 = vrot.slane %v622_v46, 4  ;;  %v1159_v49 = vsel %vm1158_vm4, %v1157_v47, %v622_v46  ;;  %v728_v1 = vrot.slane %v622_v46, 6 }
 0x856   :  { %628 = vrot.lane.b32.xlu0 %v627_v48, %s1646_s9 }
 0x8c8   :  { %v629_v29 = vpop.permute.xlu0 %628 }
 0x8c9   :  { %1496 = vmatmul.mubr.msk.f32.vlgmr.msra.gmra.mxu0 %vm302_vm2, %v629_v29 }
 0x8ca   :  { %1510 = vmatpush3.msra.mxu0 %v1762_v10  ;;  %1517 = vmatprep.mubr.msk.f32.mxu0 %vm1644_vm1, %v1643_v3 }
 0x8cb   :  { %1511 = vmatprep.subr.mxu0 %v1643_v3 }
 0x8cc   :  { %1512 = vmatpush3.msra.mxu0 %v1770_v11 }
 0x8cd   :  { %1513 = vmatprep.subr.mxu0 %v1643_v3 }
 0x8ce   :  { %1514 = vmatpush3.msra.mxu0 %v1779_v12 }
 0x8cf   :  { %1515 = vmatprep.subr.mxu0 %v1643_v3 }
 0x8d0   :  { %1516 = vmatpush3.msra.mxu0 %v1788_v13 }
 0x8d1   :  { %1531 = vmatprep.subr.mxu0 %v1643_v3 }
 0x989   :  { %v698_v50 = vpop.f32.mrf.mxu0 }
 0x98a   :  { %v699_v51 = vadd.f32 %v1829_v36, %v698_v50 }
 0x98b   :  { %v1497_v52 = vpop.f32.mrf.mxu0 }
 0x98c   :  { %v703_v53 = vrot.slane %v699_v51, 2 }
 0x98e   :  { %712 = vrot.lane.b32.xlu1 %v703_v53, %s1645_s27  ;;  %v705_v54 = vadd.f32 %v703_v53, %v1807_v30 }
 0x990   :  { %v1365_v55 = vmul.f32 -1.442695, %v705_v54 }
 0x992   :  { %1581 = vpow2.f32 %v1365_v55 }
 0x99f   :  { %v1582_v56 = vpop.eup %1581 }
 0x9a0   :  { %v709_v57 = vadd.f32 1.0, %v1582_v56 }
 0x9a2   :  { %1583 = vrcp.f32 %v709_v57 }
 0x9af   :  { %v1584_v58 = vpop.eup %1583 }
 0x9b0   :  { %v722_v0 = vsub.f32 1.0, %v1584_v58  ;;  %v730_v4 = vmul.f32 %v1584_v58, %v728_v1 }
 0xa00   :  { %v713_v59 = vpop.permute.xlu1 %712 }
 0xa01   :  { %v715_v60 = vmul.f32 %v1584_v58, %v713_v59 }
 0xa03   :  { %717 = vrot.lane.b32.xlu0 %v715_v60, %s1645_s27 }
 0xa75   :  { %v718_v61 = vpop.permute.xlu0 %717 }
 0xa76   :  { %v720_v62 = vadd.f32 %v718_v61, %v1807_v30 }
 0xa78   :  { %1585 = vtanh.f32 %v720_v62 }
 0xa85   :  { %v1586_v63 = vpop.eup %1585 }
 0xa86   :  { %724 = vrot.lane.b32.xlu1 %v1586_v63, %s1646_s9 }
 0xaf8   :  { %v725_v2 = vpop.permute.xlu1 %724 }
 0xaf9   :  { %v727_v5 = vmul.f32 %v725_v2, %v722_v0 }
 0xafb   :  { %v731_v6 = vadd.f32 %v730_v4, %v727_v5 }
 0xafd   :  { %v734_v7 = vrot.slane %v731_v6, 6  ;;  %v1897_v8 = vsel %vm1160_vm5, %v1159_v49, %v731_v6 }
 0xaff   :  { %735 = vrot.lane.b32.xlu0 %v734_v7, %s1646_s9 }
 0xb71   :  { %v736_v9 = vpop.permute.xlu0 %735 }
 0xb72   :  { %1507 = vmatmul.mubr.msk.f32.vlgmr.msra.gmra.mxu1 %vm302_vm2, %v736_v9 }
 0xb73   :  { %1521 = vmatpush3.msra.mxu1 %v1762_v10  ;;  %1528 = vmatprep.mubr.msk.f32.mxu1 %vm1644_vm1, %v1643_v3 }
 0xb74   :  { %1522 = vmatprep.subr.mxu1 %v1643_v3 }
 0xb75   :  { %1523 = vmatpush3.msra.mxu1 %v1770_v11 }
 0xb76   :  { %1524 = vmatprep.subr.mxu1 %v1643_v3 }
 0xb77   :  { %1525 = vmatpush3.msra.mxu1 %v1779_v12 }
 0xb78   :  { %1526 = vmatprep.subr.mxu1 %v1643_v3 }
 0xb79   :  { %1527 = vmatpush3.msra.mxu1 %v1788_v13 }
 0xc32   :  { %v805_v30 = vpop.f32.mrf.mxu1 }
 0xc33   :  { %v806_v14 = vadd.f32 %v1829_v36, %v805_v30 }
 0xc34   :  { %v1508_v15 = vpop.f32.mrf.mxu1 }
 0xc35   :  { %817 = vrot.lane.b32.xlu1 %v806_v14, %s1645_s27  ;;  %v809_v16 = vadd.f32 %v806_v14, %v1801_v25 }
 0xc37   :  { %v1367_v17 = vmul.f32 -1.442695, %v809_v16 }
 0xc39   :  { %1587 = vpow2.f32 %v1367_v17 }
 0xc46   :  { %v1588_v18 = vpop.eup %1587 }
 0xc47   :  { %v813_v19 = vadd.f32 1.0, %v1588_v18 }
 0xc49   :  { %1589 = vrcp.f32 %v813_v19 }
 0xc56   :  { %v1590_v20 = vpop.eup %1589 }
 0xc57   :  { %v827_v27 = vsub.f32 1.0, %v1590_v20  ;;  %v834_v31 = vmul.f32 %v1590_v20, %v734_v7 }
 0xca7   :  { %v818_v21 = vpop.permute.xlu1 %817 }
 0xca8   :  { %v820_v22 = vmul.f32 %v1590_v20, %v818_v21 }
 0xcaa   :  { %822 = vrot.lane.b32.xlu0 %v820_v22, %s1645_s27 }
 0xd1c   :  { %v823_v23 = vpop.permute.xlu0 %822 }
 0xd1d   :  { %v825_v24 = vadd.f32 %v823_v23, %v1801_v25 }
 0xd1f   :  { %1591 = vtanh.f32 %v825_v24 }
 0xd2c   :  { %v1592_v26 = vpop.eup %1591 }
 0xd2d   :  { %829 = vrot.lane.b32.xlu1 %v1592_v26, %s1646_s9 }
 0xd9f   :  { %v830_v28 = vpop.permute.xlu1 %829 }
 0xda0   :  { %v832_v35 = vmul.f32 %v830_v28, %v827_v27 }
 0xda2   :  { %v1916_v37 = vadd.f32 %v834_v31, %v832_v35 }
 0xda4   :  { %838 = vrot.lane.b32.xlu0 %v1916_v37, %s1646_s9  ;;  %v938_v48 = vrot.slane %v1916_v37, 6 }
 0xe16   :  { %v839_v38 = vpop.permute.xlu0 %838 }
 0xe17   :  { %1518 = vmatmul.mubr.msk.f32.vlgmr.msra.gmra.mxu0 %vm302_vm2, %v839_v38  ;;  %v1167_v38 = vld [vmem:[%s2008_s10 + $0x10] sm:$0xff] }
 0xe18   :  { %1532 = vmatpush3.msra.mxu0 %v1762_v10  ;;  %1539 = vmatprep.mubr.msk.f32.mxu0 %vm1644_vm1, %v1643_v3 }
 0xe19   :  { %1533 = vmatprep.subr.mxu0 %v1643_v3 }
 0xe1a   :  { %1534 = vmatpush3.msra.mxu0 %v1770_v11 }
 0xe1b   :  { %1535 = vmatprep.subr.mxu0 %v1643_v3 }
 0xe1c   :  { %1536 = vmatpush3.msra.mxu0 %v1779_v12 }
 0xe1d   :  { %1537 = vmatprep.subr.mxu0 %v1643_v3 }
 0xe1e   :  { %1538 = vmatpush3.msra.mxu0 %v1788_v13 }
 0xed7   :  { %v908_v25 = vpop.f32.mrf.mxu0 }
 0xed8   :  { %v909_v39 = vadd.f32 %v1829_v36, %v908_v25 }
 0xed9   :  { %v1519_v40 = vpop.f32.mrf.mxu0 }
 0xeda   :  { %v913_v10 = vrot.slane %v909_v39, 6 }
 0xedc   :  { %922 = vrot.lane.b32.xlu1 %v913_v10, %s1645_s27  ;;  %v915_v41 = vadd.f32 %v913_v10, %v1809_v32 }
 0xede   :  { %v1369_v42 = vmul.f32 -1.442695, %v915_v41 }
 0xee0   :  { %1593 = vpow2.f32 %v1369_v42 }
 0xeed   :  { %v1594_v11 = vpop.eup %1593 }
 0xeee   :  { %v919_v43 = vadd.f32 1.0, %v1594_v11 }
 0xef0   :  { %1595 = vrcp.f32 %v919_v43 }
 0xefd   :  { %v1596_v44 = vpop.eup %1595 }
 0xefe   :  { %v932_v47 = vsub.f32 1.0, %v1596_v44  ;;  %v940_v50 = vmul.f32 %v1596_v44, %v938_v48  ;;  %v1261_v48 = vld [vmem:[%s2000_s2] sm:$0xff] }
 0xf4e   :  { %v923_v12 = vpop.permute.xlu1 %922 }
 0xf4f   :  { %v925_v45 = vmul.f32 %v1596_v44, %v923_v12  ;;  %v1374_v12 = vld [vmem:[%s2009_s11] ss:$0 sm:$0xff] }
 0xf51   :  { %927 = vrot.lane.b32.xlu0 %v925_v45, %s1645_s27 }
 0xfc3   :  { %v928_v3 = vpop.permute.xlu0 %927 }
 0xfc4   :  { %v930_v13 = vadd.f32 %v928_v3, %v1809_v32 }
 0xfc6   :  { %1597 = vtanh.f32 %v930_v13 }
 0xfd3   :  { %v1598_v46 = vpop.eup %1597 }
 0xfd4   :  { %934 = vrot.lane.b32.xlu1 %v1598_v46, %s1646_s9 }
0x1046   :  { %v935_v49 = vpop.permute.xlu1 %934 }
0x1047   :  { %v937_v29 = vmul.f32 %v935_v49, %v932_v47 }
0x1049   :  { %v941_v51 = vadd.f32 %v940_v50, %v937_v29  ;;  %v1287_v29 = vsel %vm54_vm0, %v1261_v48, 0.0 }
0x104b   :  { %v944_v52 = vrot.slane %v941_v51, 2  ;;  %v1045_v5 = vrot.slane %v941_v51, 6  ;;  %v1162_v14 = vsel %vm1156_vm3, %v1916_v37, %v941_v51  ;;  %v1168_v37 = vld [vmem:[%s2008_s10 + $0x18] sm:$0xff] }
0x104c   :  { %1542 = vmatprep.subr.mxu1 %v1168_v37 }
0x104d   :  { %945 = vrot.lane.b32.xlu0 %v944_v52, %s1646_s9 }
0x10bf   :  { %v946_v53 = vpop.permute.xlu0 %945 }
0x10c0   :  { %1529 = vmatmul.mubr.msk.f32.vlgmr.msra.gmra.mxu1 %vm302_vm2, %v946_v53 }
0x10c1   :  { %1543 = vmatpush3.msra.mxu1 %v1168_v37 }
0x10c2   :  { %1544 = vmatprep.subr.mxu1 %v1167_v38 }
0x10c3   :  { %1545 = vmatpush3.msra.mxu1 %v1167_v38 }
0x1180   :  { %v1015_v54 = vpop.f32.mrf.mxu1 }
0x1181   :  { %v1016_v32 = vadd.f32 %v1829_v36, %v1015_v54 }
0x1182   :  { %v1530_v55 = vpop.f32.mrf.mxu1 }
0x1183   :  { %v1020_v56 = vrot.slane %v1016_v32, 4 }
0x1185   :  { %1029 = vrot.lane.b32.xlu1 %v1020_v56, %s1645_s27  ;;  %v1022_v57 = vadd.f32 %v1020_v56, %v1811_v33 }
0x1187   :  { %v1371_v58 = vmul.f32 -1.442695, %v1022_v57 }
0x1189   :  { %1599 = vpow2.f32 %v1371_v58 }
0x1196   :  { %v1600_v59 = vpop.eup %1599 }
0x1197   :  { %v1026_v60 = vadd.f32 1.0, %v1600_v59 }
0x1199   :  { %1601 = vrcp.f32 %v1026_v60 }
0x11a6   :  { %v1602_v61 = vpop.eup %1601 }
0x11a7   :  { %v1039_v4 = vsub.f32 1.0, %v1602_v61  ;;  %v1047_v7 = vmul.f32 %v1602_v61, %v1045_v5 }
0x11f7   :  { %v1030_v62 = vpop.permute.xlu1 %1029 }
0x11f8   :  { %v1032_v63 = vmul.f32 %v1602_v61, %v1030_v62  ;;  %v1262_v61 = vld [vmem:[%s2000_s2 + $0x8] sm:$0xff] }
0x11f9   :  { %v1290_v62 = vsel %vm54_vm0, %v1262_v61, 0.0 }
0x11fa   :  { %1034 = vrot.lane.b32.xlu0 %v1032_v63, %s1645_s27 }
0x126c   :  { %v1035_v0 = vpop.permute.xlu0 %1034 }
0x126d   :  { %v1037_v1 = vadd.f32 %v1035_v0, %v1811_v33 }
0x126f   :  { %1603 = vtanh.f32 %v1037_v1 }
0x127c   :  { %v1604_v2 = vpop.eup %1603 }
0x127d   :  { %1041 = vrot.lane.b32.xlu1 %v1604_v2, %s1646_s9 }
0x12ef   :  { %v1042_v6 = vpop.permute.xlu1 %1041 }
0x12f0   :  { %v1044_v9 = vmul.f32 %v1042_v6, %v1039_v4 }
0x12f2   :  { %v1048_v30 = vadd.f32 %v1047_v7, %v1044_v9 }
0x12f4   :  { %v1051_v15 = vrot.slane %v1048_v30, 4  ;;  %v1163_v16 = vsel %vm1158_vm4, %v1162_v14, %v1048_v30  ;;  %v1152_v40 = vrot.slane %v1048_v30, 6 }
0x12f6   :  { %1052 = vrot.lane.b32.xlu0 %v1051_v15, %s1646_s9 }
0x1368   :  { %v1053_v17 = vpop.permute.xlu0 %1052 }
0x1369   :  { %1540 = vmatmul.mubr.msk.f32.vlgmr.msra.gmra.mxu0 %vm302_vm2, %v1053_v17 }
0x1429   :  { %v1122_v33 = vpop.f32.mrf.mxu0 }
0x142a   :  { %v1123_v18 = vadd.f32 %v1829_v36, %v1122_v33 }
0x142b   :  { %v1541_v19 = vpop.f32.mrf.mxu0 }
0x142c   :  { %v1127_v20 = vrot.slane %v1123_v18, 2 }
0x142e   :  { %1136 = vrot.lane.b32.xlu1 %v1127_v20, %s1645_s27  ;;  %v1129_v21 = vadd.f32 %v1127_v20, %v1813_v34 }
0x1430   :  { %v1373_v22 = vmul.f32 -1.442695, %v1129_v21 }
0x1432   :  { %1605 = vpow2.f32 %v1373_v22 }
0x143f   :  { %v1606_v23 = vpop.eup %1605 }
0x1440   :  { %v1133_v24 = vadd.f32 1.0, %v1606_v23 }
0x1442   :  { %1607 = vrcp.f32 %v1133_v24 }
0x144f   :  { %v1608_v26 = vpop.eup %1607 }
0x1450   :  { %v1146_v39 = vsub.f32 1.0, %v1608_v26  ;;  %v1154_v41 = vmul.f32 %v1608_v26, %v1152_v40 }
0x14a0   :  { %v1137_v27 = vpop.permute.xlu1 %1136 }
0x14a1   :  { %v1139_v28 = vmul.f32 %v1608_v26, %v1137_v27 }
0x14a3   :  { %1141 = vrot.lane.b32.xlu0 %v1139_v28, %s1645_s27 }
0x14a7   :  { %1178 = vrot.lane.b32.xlu0 %v1897_v8, %s1646_s9  ;;  %v1166_v8 = vld [vmem:[%s2008_s10 + $0x8] sm:$0xff] }
0x14a8   :  { %1546 = vmatprep.subr.mxu1 %v1166_v8 }
0x14a9   :  { %1547 = vmatpush3.msra.mxu1 %v1166_v8 }
0x1515   :  { %v1142_v36 = vpop.permute.xlu0 %1141 }
0x1516   :  { %v1144_v31 = vadd.f32 %v1142_v36, %v1813_v34  ;;  %v1165_v34 = vld [vmem:[%s2008_s10] sm:$0xff] }
0x1517   :  { %1548 = vmatprep.subr.mxu1 %v1165_v34 }
0x1518   :  { %1609 = vtanh.f32 %v1144_v31  ;;  %1549 = vmatpush3.msra.mxu1 %v1165_v34 }
0x1519   :  { %v1179_v35 = vpop.permute.xlu0 %1178 }
0x151a   :  { %1550 = vmatprep.mubr.msk.f32.mxu1 %vm302_vm2, %v1179_v35 }
0x1525   :  { %v1610_v25 = vpop.eup %1609 }
0x1526   :  { %1148 = vrot.lane.b32.xlu1 %v1610_v25, %s1646_s9 }
0x1598   :  { %v1149_v10 = vpop.permute.xlu1 %1148 }
0x1599   :  { %v1151_v42 = vmul.f32 %v1149_v10, %v1146_v39 }
0x159b   :  { %v1155_v11 = vadd.f32 %v1154_v41, %v1151_v42 }
0x159d   :  { %v1164_v43 = vsel %vm1160_vm5, %v1163_v16, %v1155_v11 }
0x159e   :  { %1180 = vrot.lane.b32.xlu1 %v1164_v43, %s1646_s9 }
0x1610   :  { %v1181_v44 = vpop.permute.xlu1 %1180 }
0x1611   :  { %1551 = vmatmul.mubr.msk.f32.vlgmr.msra.gmra.mxu1 %vm302_vm2, %v1181_v44 }
0x16d1   :  { %v1552_v45 = vpop.f32.mrf.mxu1 }
0x16d2   :  { %v1258_v3 = vadd.f32 %v1552_v45, %v1374_v12 }
0x16d3   :  { %v1252_v13 = vpop.f32.mrf.mxu1 }
0x16d4   :  { %v1253_v46 = vadd.f32 %v1374_v12, %v1252_v13  ;;  %v1266_v47 = vsel %vm54_vm0, %v1258_v3, -inf  ;;  %v1294_v63 = vmul.f32 %v1262_v61, %v1258_v3 }
0x16d5   :  { %1267 = vmax.xlane.f32.xlu1 %v1266_v47 }
0x16d6   :  { %v1263_v49 = vsel %vm54_vm0, %v1253_v46, -inf  ;;  %v1293_v50 = vmul.f32 %v1261_v48, %v1253_v46  ;;  %v1298_v0 = vsel %vm54_vm0, %v1294_v63, 0.0 }
0x16d7   :  { %1264 = vmax.xlane.f32.xlu0 %v1263_v49 }
0x16d8   :  { %v1295_v51 = vsel %vm54_vm0, %v1293_v50, 0.0 }
0x16d9   :  { %1288 = vadd.xlane.f32.xlu1 %v1287_v29 }
0x16dd   :  { %1296 = vadd.xlane.f32.xlu1 %v1295_v51 }
0x175e   :  { %v1268_v52 = vpop.xlane.xlu1 %1267 }
0x175f   :  { %v1270_v53 = vsub.f32 %v1258_v3, %v1268_v52 }
0x1760   :  { %v1265_v54 = vpop.xlane.xlu0 %1264 }
0x1761   :  { %v1269_v32 = vsub.f32 %v1253_v46, %v1265_v54  ;;  %v1273_v55 = vmul.f32 1.442695, %v1270_v53 }
0x1762   :  { %v1289_v4 = vpop.xlane.xlu1 %1288 }
0x1763   :  { %v1271_v56 = vmul.f32 1.442695, %v1269_v32  ;;  %v1319_v5 = vsel %vm1305_vm6, %v1289_v4, 0.0 }
0x1765   :  { %1611 = vpow2.f32 %v1271_v56 }
0x1766   :  { %1613 = vpow2.f32 %v1273_v55  ;;  %v1297_v19 = vpop.xlane.xlu1 %1296 }
0x1772   :  { %v1612_v57 = vpop.eup %1611 }
0x1773   :  { %v1275_v58 = vsel %vm54_vm0, %v1612_v57, 0.0  ;;  %v1614_v59 = vpop.eup %1613 }
0x1774   :  { %1276 = vadd.xlane.f32.xlu0 %v1275_v58  ;;  %v1278_v60 = vsel %vm54_vm0, %v1614_v59, 0.0 }
0x1778   :  { %1279 = vadd.xlane.f32.xlu0 %v1278_v60 }
0x177c   :  { %1291 = vadd.xlane.f32.xlu0 %v1290_v62 }
0x1780   :  { %1299 = vadd.xlane.f32.xlu0 %v1298_v0 }
0x17fd   :  { %v1277_v1 = vpop.xlane.xlu0 %1276 }
0x17fe   :  { %1615 = vlog2.f32 %v1277_v1 }
0x1801   :  { %v1280_v2 = vpop.xlane.xlu0 %1279 }
0x1802   :  { %1617 = vlog2.f32 %v1280_v2 }
0x1805   :  { %v1292_v6 = vpop.xlane.xlu0 %1291 }
0x1806   :  { %v1320_v7 = vsel %vm1305_vm6, %v1292_v6, 0.0 }
0x1807   :  { %v1321_v9 = vadd.f32 %v1320_v7, %v1319_v5 }
0x1809   :  { %1322 = vadd.xlane.f32.xlu0 %v1321_v9  ;;  %v1300_v22 = vpop.xlane.xlu0 %1299 }
0x180b   :  { %v1616_v30 = vpop.eup %1615 }
0x180c   :  { %v1282_v14 = vmul.f32 0.6931472, %v1616_v30 }
0x180e   :  { %v1285_v15 = vadd.f32 %v1282_v14, %v1265_v54 }
0x180f   :  { %v1618_v16 = vpop.eup %1617 }
0x1810   :  { %v1284_v17 = vmul.f32 0.6931472, %v1618_v16  ;;  %v1301_v33 = vmul.f32 %v1289_v4, %v1285_v15 }
0x1812   :  { %v1286_v18 = vadd.f32 %v1284_v17, %v1268_v52  ;;  %v1303_v21 = vsub.f32 %v1301_v33, %v1297_v19 }
0x1814   :  { %v1302_v20 = vmul.f32 %v1292_v6, %v1286_v18  ;;  %v1306_v24 = vsel %vm1305_vm6, %v1303_v21, 0.0 }
0x1816   :  { %v1304_v23 = vsub.f32 %v1302_v20, %v1300_v22 }
0x1818   :  { %v1307_v26 = vsel %vm1305_vm6, %v1304_v23, 0.0 }
0x1819   :  { %v1308_v27 = vadd.f32 %v1307_v26, %v1306_v24 }
0x181b   :  { %1309 = vadd.xlane.f32.xlu1 %v1308_v27 }
0x1892   :  { %v1323_v28 = vpop.xlane.xlu0 %1322 }
0x1893   :  { %v1324_v36 = vrot.slane %v1323_v28, 4 }
0x1895   :  { %v1325_v31 = vadd.f32 %v1324_v36, %v1323_v28 }
0x1897   :  { %v1326_v35 = vrot.slane %v1325_v31, 2 }
0x1899   :  { %v1327_v34 = vadd.f32 %v1326_v35, %v1325_v31 }
0x189b   :  { %v1328_v40 = vrot.slane %v1327_v34, 1 }
0x189d   :  { %v1329_v42 = vadd.f32 %v1328_v40, %v1327_v34 }
0x18a4   :  { %v1310_v37 = vpop.xlane.xlu1 %1309 }
0x18a5   :  { %v1311_v38 = vrot.slane %v1310_v37, 4 }
0x18a7   :  { %v1312_v8 = vadd.f32 %v1311_v38, %v1310_v37 }
0x18a9   :  { %v1313_v25 = vrot.slane %v1312_v8, 2 }
0x18ab   :  { %v1314_v39 = vadd.f32 %v1313_v25, %v1312_v8 }
0x18ad   :  { %v1315_v10 = vrot.slane %v1314_v39, 1 }
0x18af   :  { %v1316_v41 = vadd.f32 %v1315_v10, %v1314_v39 }
0x18b1   :  { %1553 = vpush %v1316_v41 }
0x18b2   :  { %1555 = vpush %v1329_v42 }
0x18e2   :  { %s1554_s2 = spop %1553 }
0x18e3   :  { %s1556_s18 = spop %1555  ;;  %v1318_v12 = vstv %s1554_s2 }
0x18e4   :  { %v1331_v11 = vstv %s1556_s18 }
0x18e5   :  { %v1332_v43 = vmax.f32 %v1331_v11, 1.0 }
0x18e7   :  { %1619 = vrcp.f32 %v1332_v43 }
0x18f4   :  { %v1620_v44 = vpop.eup %1619 }
0x18f5   :  { %v1334_v45 = vmul.f32 %v1620_v44, %v1318_v12 }
0x18f7   :  { %1336 = vst.msk [vmem:[#allocation2] sm:$0x1] %vm1335_vm7, %v1334_v45 }
0x18f8   :  { %1632 = shalt.err (!%p1629_p4)
}
0x18f9   :  { %1346 = dma.vmem_to_hbm [thread:$0]  %s1344_s20, 16, %s2010_s12, [#allocation3]  }
0x18fa   :  { %1641 = dma.done.wait [#allocation3], 16  }
0x18fb   :  { %1642 = vsyncadd [#allocation3], 4294967280 }
0x18fc   :  { %1350 = vsyncpa [#allocation3], 1 }

</bundles_post_ra>
